<compile_context>
chip_gen: v5e
topology: v5e:2x2
jax: 0.10.0
libtpu: 0.0.40
codegen_flags: <defaults>
</compile_context>

<pallas_src>
import functools

import jax
import jax.numpy as jnp
from jax.experimental import pallas as pl
from jax.experimental.pallas import tpu as pltpu


_MAX_LANE_TILE = 2048                    # lanes per grid step (x8 sublanes of batch)
_VMEM_BUDGET_BYTES = 24 * 1024 * 1024    # double-buffered in+out; fits v7x scoped VMEM


def _leaf_offsets(leaf_dims, d):
    """Static row offsets of each leaf's J block and [metric | momentum] block."""
    offs, row = [], 0
    for m in leaf_dims:
        joff = row
        aoff = row + m * d
        offs.append((m, joff, aoff))
        row = aoff + m * (m + 1)
    return offs, row


def _choose_lane_tile(n_rows, d, n_lanes):
    """Lane-tile width for a batch-lane dimension of size n_lanes."""
    per_lane = (n_rows + d + d * d) * 8 * 4 * 2      # in + out, double-buffered
    cap = (_VMEM_BUDGET_BYTES // per_lane) // 128 * 128
    cap = int(max(128, min(_MAX_LANE_TILE, cap)))
    if n_lanes <= cap:
        return int(n_lanes)                          # single block, full lane extent
    # Large batch: tile lanes; keep >=2 tiles so the 'parallel' grid axis can
    # shard across v7x's two TensorCores.
    bt = min(cap, -(-n_lanes // 2))
    return int(max(128, bt // 128 * 128))


# ----------------------------------------------------------------------------
# Pallas kernel: fused pullback over all leaves (ragged-packed) in one call.
# ----------------------------------------------------------------------------
def _pullback_kernel(scal_ref, x_ref, mr_ref, Mr_ref, *, leaf_dims, cspace_dims):
    """Batch-packed layouts (b = sublane * BL + lane):
      scal_ref: (L,) f32 in SMEM       per-leaf metric scaling
      x_ref   : (N, 8, bt) f32, per leaf l with dim M (static row offsets):
                  x[joff + j*D + i]       = J_l[b, j, i]
                  x[aoff + j*(M+1) + k]   = metric_l[b, j, k]     (k < M)
                  x[aoff + j*(M+1) + M]   = momentum_l[b, j]
      mr_ref  : (D, 8, bt)             mr[i]      = momentum_root[b, i]
      Mr_ref  : (D, D, 8, bt)          Mr[i, lp]  = metric_root[b, i, lp]
    """
    D = cspace_dims
    bt = x_ref.shape[-1]
    cw = 128 if bt % 128 == 0 else bt        # per-op lane chunk (<= 1 vreg wide)
    n_chunks = bt // cw

    offs, n_rows = _leaf_offsets(leaf_dims, D)
    assert n_rows == x_ref.shape[0]

    def process_chunk(lanes):
        zero = jnp.zeros((8, cw), jnp.float32)
        mr_acc = [zero for _ in range(D)]
        Mr_acc = [[zero for _ in range(D)] for _ in range(D)]

        for leaf_idx, (M, joff, aoff) in enumerate(offs):
            s = scal_ref[leaf_idx]
            # All J rows of this leaf for the current lane chunk (M*D tiles).
            Jrows = [[x_ref[joff + j * D + i, :, lanes] for i in range(D)]
                     for j in range(M)]
            for j in range(M):
                arow = aoff + j * (M + 1)
                # momentum column:  mr[i] += s * p[j] * J[j, i]
                p_j = s * x_ref[arow + M, :, lanes]
                for i in range(D):
                    mr_acc[i] = mr_acc[i] + p_j * Jrows[j][i]
                # t[lp] = s * sum_k metric[j, k] * J[k, lp]   (scale folded into A)
                t = [zero for _ in range(D)]
                for k in range(M):
                    a_jk = s * x_ref[arow + k, :, lanes]
                    for lp in range(D):
                        t[lp] = t[lp] + a_jk * Jrows[k][lp]
                # metric pullback:  Mr[i, lp] += J[j, i] * t[lp]
                for i in range(D):
                    for lp in range(D):
                        Mr_acc[i][lp] = Mr_acc[i][lp] + Jrows[j][i] * t[lp]

        for i in range(D):
            mr_ref[i, :, lanes] = mr_acc[i]
            for lp in range(D):
                Mr_ref[i, lp, :, lanes] = Mr_acc[i][lp]

    if n_chunks == 1:
        process_chunk(slice(None))
    else:
        @pl.loop(0, n_chunks)
        def _(c):
            c0 = pl.multiple_of(c * cw, cw)
            process_chunk(pl.ds(c0, cw))


def pullback_pallas(x_packed, scalings, leaf_dims, cspace_dims, lane_tile):
    """x_packed: (N, 8, BL) f32, scalings: (L,) f32 -> ((D,8,BL), (D,D,8,BL))."""
    n_rows, _, n_lanes = x_packed.shape
    D = cspace_dims
    bt = lane_tile
    nb = n_lanes // bt

    kernel = functools.partial(
        _pullback_kernel,
        leaf_dims=tuple(int(m) for m in leaf_dims),
        cspace_dims=D)

    block_bytes = (n_rows + D + D * D) * 8 * bt * 4
    vmem_limit = int(min(64 * 1024 * 1024,
                         max(8 * 1024 * 1024, 4 * block_bytes)))

    return pl.pallas_call(
        kernel,
        out_shape=(jax.ShapeDtypeStruct((D, 8, n_lanes), jnp.float32),
                   jax.ShapeDtypeStruct((D, D, 8, n_lanes), jnp.float32)),
        grid_spec=pltpu.PrefetchScalarGridSpec(
            num_scalar_prefetch=1,
            grid=(nb,),
            in_specs=[
                pl.BlockSpec((n_rows, 8, bt), lambda b, scal: (0, 0, b)),
            ],
            out_specs=[
                pl.BlockSpec((D, 8, bt), lambda b, scal: (0, 0, b)),
                pl.BlockSpec((D, D, 8, bt), lambda b, scal: (0, 0, 0, b)),
            ],
        ),
        compiler_params=pltpu.CompilerParams(
            dimension_semantics=("parallel",),
            vmem_limit_bytes=vmem_limit),
    )(scalings, x_packed)


# ----------------------------------------------------------------------------
# Simple deterministic stand-in for a lagrangian velocity net.
# TODO(synk): the real lagrangian_vel_nets are unspecified externally-built
# modules; a small deterministic MLP producing (momentum, PSD metric) stands in.
# ----------------------------------------------------------------------------
class SimpleLagrangianVelNet:
    def __init__(self, key, leaf_dim, hidden=32):
        k1, k2, k3 = jax.random.split(key, 3)
        self.leaf_dim = leaf_dim
        self.W1 = 0.1 * jax.random.normal(k1, (leaf_dim, hidden), jnp.float32)
        self.Wp = 0.1 * jax.random.normal(k2, (hidden, leaf_dim), jnp.float32)
        self.Wl = 0.1 * jax.random.normal(k3, (hidden, leaf_dim * leaf_dim),
                                          jnp.float32)

    def __call__(self, x):
        h = jnp.tanh(x @ self.W1)
        p = h @ self.Wp
        Lm = (h @ self.Wl).reshape(x.shape[0], self.leaf_dim, self.leaf_dim)
        Mm = Lm @ jnp.swapaxes(Lm, -1, -2) + jnp.eye(self.leaf_dim,
                                                     dtype=jnp.float32)[None]
        return p, Mm


# ----------------------------------------------------------------------------
# ContextMomentumNet2 forward (glue in JAX, hot path in the Pallas kernel)
# ----------------------------------------------------------------------------
class ContextMomentumNet2:
    def __init__(self, lagrangian_vel_nets, cspace_dims, metric_scaling=None,
                 name=None):
        self.lagrangian_vel_nets = list(lagrangian_vel_nets)
        self.cspace_dims = cspace_dims
        self.name = name
        if metric_scaling is None:
            self.metric_scaling = [1.0 for _ in self.lagrangian_vel_nets]
        else:
            self.metric_scaling = metric_scaling
        assert len(self.metric_scaling) == len(self.lagrangian_vel_nets)

    def __call__(self, state, q_leaf_list, J_list, momentum_list, metric_list):
        assert state.ndim in (1, 2, 3)
        if state.ndim == 1:
            state = state[None, :]
        elif state.ndim == 3:
            assert state.shape[2] == 1
            state = state[:, :, 0]
        assert state.ndim == 2 and state.shape[1] == self.cspace_dims
        B = state.shape[0]
        D = self.cspace_dims

        jacobians, pieces, leaf_dims = [], [], []
        for net, x, J, momentum, metric in zip(
                self.lagrangian_vel_nets, q_leaf_list, J_list,
                momentum_list, metric_list):
            if net is not None:
                momentum, metric = net(x)
                jacobians.append(J)
            M = J.shape[1]
            leaf_dims.append(M)
            # ragged packing: J rows then [metric | momentum] rows, flattened
            a_aug = jnp.concatenate(
                [metric.astype(jnp.float32),
                 momentum.astype(jnp.float32)[:, :, None]], axis=2)
            pieces.append(J.astype(jnp.float32).reshape(B, M * D))
            pieces.append(a_aug.reshape(B, M * (M + 1)))

        x_flat = jnp.concatenate(pieces, axis=1)          # (B, N) batch-major
        n_rows = x_flat.shape[1]

        # batch -> (sublane=8, lanes) packing, single transpose of one buffer
        n_lanes = -(-B // 8)
        bt = _choose_lane_tile(n_rows, D, n_lanes)
        n_lanes_p = -(-n_lanes // bt) * bt
        Bp = 8 * n_lanes_p
        if Bp != B:
            x_flat = jnp.pad(x_flat, ((0, Bp - B), (0, 0)))
        x_packed = jnp.transpose(x_flat, (1, 0)).reshape(n_rows, 8, n_lanes_p)

        scalings = jnp.asarray(self.metric_scaling, dtype=jnp.float32)
        mr, Mr = pullback_pallas(x_packed, scalings, leaf_dims, D, bt)

        momentum_root = jnp.transpose(mr.reshape(D, Bp), (1, 0))[:B]
        metric_root = jnp.transpose(Mr.reshape(D, D, Bp), (2, 0, 1))[:B]
        assert momentum_root.shape == (B, D)
        assert metric_root.shape == (B, D, D)
        return momentum_root, metric_root, jacobians


# Pure-JAX reference (mirrors the torch forward exactly) for verification.
def reference_forward(net_obj, state, q_leaf_list, J_list, momentum_list,
                      metric_list):
    q = state
    n, d = q.shape
    momentum_root = jnp.zeros((n, d), jnp.float32)
    metric_root = jnp.zeros((n, d, d), jnp.float32)
    hp = jax.lax.Precision.HIGHEST
    for net, x, J, momentum, metric, scaling in zip(
            net_obj.lagrangian_vel_nets, q_leaf_list, J_list,
            momentum_list, metric_list, net_obj.metric_scaling):
        if net is not None:
            momentum, metric = net(x)
        momentum_root = momentum_root + scaling * jnp.einsum(
            'bji,bj->bi', J, momentum, precision=hp)
        metric_root = metric_root + scaling * jnp.einsum(
            'bji,bjk,bkl->bil', J, metric, J, precision=hp)
    return momentum_root, metric_root


def _make_inputs(key, B, D, leaf_dims):
    keys = jax.random.split(key, len(leaf_dims))
    q_leaf_list, J_list, momentum_list, metric_list = [], [], [], []
    for li, m_i in enumerate(leaf_dims):
        kq, kj, kp, km = jax.random.split(keys[li], 4)
        q_leaf_list.append(jax.random.normal(kq, (B, m_i), jnp.float32))
        J_list.append(jax.random.normal(kj, (B, m_i, D), jnp.float32))
        momentum_list.append(jax.random.normal(kp, (B, m_i), jnp.float32))
        A = jax.random.normal(km, (B, m_i, m_i), jnp.float32)
        metric_list.append(A @ jnp.swapaxes(A, -1, -2)
                           + jnp.eye(m_i, dtype=jnp.float32)[None])
    return q_leaf_list, J_list, momentum_list, metric_list


if __name__ == "__main__":
    key = jax.random.PRNGKey(0)
    D = 4                       # cspace_dims
    leaf_dims = [3, 4, 2]
    scalings = [1.0, 0.5, 2.0]

    knet0, knet1, kdata = jax.random.split(key, 3)
    # Leaf 0 and leaf 2 have nets; leaf 1 uses the provided momentum/metric.
    nets = [SimpleLagrangianVelNet(knet0, leaf_dims[0]),
            None,
            SimpleLagrangianVelNet(knet1, leaf_dims[2])]
    model = ContextMomentumNet2(nets, D, metric_scaling=scalings)

    # B=2 exercises the tiny single-chunk path; B=2048 exercises the in-kernel
    # 128-lane chunk loop with a fully packed (8, 256) batch layout.
    for B in (2, 2048):
        kst, kin = jax.random.split(jax.random.fold_in(kdata, B))
        state = jax.random.normal(kst, (B, D), jnp.float32)
        q_leaf_list, J_list, momentum_list, metric_list = _make_inputs(
            kin, B, D, leaf_dims)

        momentum_root, metric_root, jacobians = model(
            state, q_leaf_list, J_list, momentum_list, metric_list)
        momentum_root = jax.block_until_ready(momentum_root)
        metric_root = jax.block_until_ready(metric_root)

        mr_ref, Mr_ref = reference_forward(model, state, q_leaf_list, J_list,
                                           momentum_list, metric_list)
        assert momentum_root.shape == (B, D)
        assert metric_root.shape == (B, D, D)
        assert len(jacobians) == 2   # only leaves with a net append their Jacobian
        assert jnp.allclose(momentum_root, mr_ref, rtol=1e-4, atol=1e-3)
        assert jnp.allclose(metric_root, Mr_ref, rtol=1e-4, atol=1e-3)

    print("KERNEL_OK")
</pallas_src>

<mosaic_0001>
module attributes {stable_mosaic.version = 11 : i64} {
  func.func @_pullback_kernel(%arg0: i32, %arg1: memref<3xf32, #tpu.memory_space<smem>>, %arg2: memref<74x8x1xf32, #tpu.memory_space<vmem>>, %arg3: memref<4x8x1xf32, #tpu.memory_space<vmem>>, %arg4: memref<4x4x8x1xf32, #tpu.memory_space<vmem>>) attributes {dimension_semantics = [#tpu.dimension_semantics<parallel>], iteration_bounds = array<i64: 1>, scalar_prefetch = 1 : i64, scratch_operands = 0 : i64, tpu.core_type = #tpu.core_type<tc>, window_params = [{transform_indices = @transform_0, window_bounds = array<i64: 74, 8, 1>}, {transform_indices = @transform_1, window_bounds = array<i64: 4, 8, 1>}, {transform_indices = @transform_2, window_bounds = array<i64: 4, 4, 8, 1>}]} {
    %cst = arith.constant 0.000000e+00 : f32
    %0 = vector.broadcast %cst : f32 to vector<8x1xf32>
    %c0 = arith.constant 0 : index
    %1 = memref.load %arg1[%c0] : memref<3xf32, #tpu.memory_space<smem>>
    %c0_0 = arith.constant 0 : index
    %c0_1 = arith.constant 0 : index
    %c0_2 = arith.constant 0 : index
    %2 = vector.load %arg2[%c0_0, %c0_1, %c0_2] : memref<74x8x1xf32, #tpu.memory_space<vmem>>, vector<1x8x1xf32>
    %3 = vector.shape_cast %2 : vector<1x8x1xf32> to vector<8x1xf32>
    %c1 = arith.constant 1 : index
    %c0_3 = arith.constant 0 : index
    %c0_4 = arith.constant 0 : index
    %4 = vector.load %arg2[%c1, %c0_3, %c0_4] : memref<74x8x1xf32, #tpu.memory_space<vmem>>, vector<1x8x1xf32>
    %5 = vector.shape_cast %4 : vector<1x8x1xf32> to vector<8x1xf32>
    %c2 = arith.constant 2 : index
    %c0_5 = arith.constant 0 : index
    %c0_6 = arith.constant 0 : index
    %6 = vector.load %arg2[%c2, %c0_5, %c0_6] : memref<74x8x1xf32, #tpu.memory_space<vmem>>, vector<1x8x1xf32>
    %7 = vector.shape_cast %6 : vector<1x8x1xf32> to vector<8x1xf32>
    %c3 = arith.constant 3 : index
    %c0_7 = arith.constant 0 : index
    %c0_8 = arith.constant 0 : index
    %8 = vector.load %arg2[%c3, %c0_7, %c0_8] : memref<74x8x1xf32, #tpu.memory_space<vmem>>, vector<1x8x1xf32>
    %9 = vector.shape_cast %8 : vector<1x8x1xf32> to vector<8x1xf32>
    %c4 = arith.constant 4 : index
    %c0_9 = arith.constant 0 : index
    %c0_10 = arith.constant 0 : index
    %10 = vector.load %arg2[%c4, %c0_9, %c0_10] : memref<74x8x1xf32, #tpu.memory_space<vmem>>, vector<1x8x1xf32>
    %11 = vector.shape_cast %10 : vector<1x8x1xf32> to vector<8x1xf32>
    %c5 = arith.constant 5 : index
    %c0_11 = arith.constant 0 : index
    %c0_12 = arith.constant 0 : index
    %12 = vector.load %arg2[%c5, %c0_11, %c0_12] : memref<74x8x1xf32, #tpu.memory_space<vmem>>, vector<1x8x1xf32>
    %13 = vector.shape_cast %12 : vector<1x8x1xf32> to vector<8x1xf32>
    %c6 = arith.constant 6 : index
    %c0_13 = arith.constant 0 : index
    %c0_14 = arith.constant 0 : index
    %14 = vector.load %arg2[%c6, %c0_13, %c0_14] : memref<74x8x1xf32, #tpu.memory_space<vmem>>, vector<1x8x1xf32>
    %15 = vector.shape_cast %14 : vector<1x8x1xf32> to vector<8x1xf32>
    %c7 = arith.constant 7 : index
    %c0_15 = arith.constant 0 : index
    %c0_16 = arith.constant 0 : index
    %16 = vector.load %arg2[%c7, %c0_15, %c0_16] : memref<74x8x1xf32, #tpu.memory_space<vmem>>, vector<1x8x1xf32>
    %17 = vector.shape_cast %16 : vector<1x8x1xf32> to vector<8x1xf32>
    %c8 = arith.constant 8 : index
    %c0_17 = arith.constant 0 : index
    %c0_18 = arith.constant 0 : index
    %18 = vector.load %arg2[%c8, %c0_17, %c0_18] : memref<74x8x1xf32, #tpu.memory_space<vmem>>, vector<1x8x1xf32>
    %19 = vector.shape_cast %18 : vector<1x8x1xf32> to vector<8x1xf32>
    %c9 = arith.constant 9 : index
    %c0_19 = arith.constant 0 : index
    %c0_20 = arith.constant 0 : index
    %20 = vector.load %arg2[%c9, %c0_19, %c0_20] : memref<74x8x1xf32, #tpu.memory_space<vmem>>, vector<1x8x1xf32>
    %21 = vector.shape_cast %20 : vector<1x8x1xf32> to vector<8x1xf32>
    %c10 = arith.constant 10 : index
    %c0_21 = arith.constant 0 : index
    %c0_22 = arith.constant 0 : index
    %22 = vector.load %arg2[%c10, %c0_21, %c0_22] : memref<74x8x1xf32, #tpu.memory_space<vmem>>, vector<1x8x1xf32>
    %23 = vector.shape_cast %22 : vector<1x8x1xf32> to vector<8x1xf32>
    %c11 = arith.constant 11 : index
    %c0_23 = arith.constant 0 : index
    %c0_24 = arith.constant 0 : index
    %24 = vector.load %arg2[%c11, %c0_23, %c0_24] : memref<74x8x1xf32, #tpu.memory_space<vmem>>, vector<1x8x1xf32>
    %25 = vector.shape_cast %24 : vector<1x8x1xf32> to vector<8x1xf32>
    %c15 = arith.constant 15 : index
    %c0_25 = arith.constant 0 : index
    %c0_26 = arith.constant 0 : index
    %26 = vector.load %arg2[%c15, %c0_25, %c0_26] : memref<74x8x1xf32, #tpu.memory_space<vmem>>, vector<1x8x1xf32>
    %27 = vector.shape_cast %26 : vector<1x8x1xf32> to vector<8x1xf32>
    %28 = vector.broadcast %1 : f32 to vector<8x1xf32>
    %29 = arith.mulf %28, %27 : vector<8x1xf32>
    %30 = arith.mulf %29, %3 : vector<8x1xf32>
    %31 = arith.addf %0, %30 : vector<8x1xf32>
    %32 = arith.mulf %29, %5 : vector<8x1xf32>
    %33 = arith.addf %0, %32 : vector<8x1xf32>
    %34 = arith.mulf %29, %7 : vector<8x1xf32>
    %35 = arith.addf %0, %34 : vector<8x1xf32>
    %36 = arith.mulf %29, %9 : vector<8x1xf32>
    %37 = arith.addf %0, %36 : vector<8x1xf32>
    %c12 = arith.constant 12 : index
    %c0_27 = arith.constant 0 : index
    %c0_28 = arith.constant 0 : index
    %38 = vector.load %arg2[%c12, %c0_27, %c0_28] : memref<74x8x1xf32, #tpu.memory_space<vmem>>, vector<1x8x1xf32>
    %39 = vector.shape_cast %38 : vector<1x8x1xf32> to vector<8x1xf32>
    %40 = vector.broadcast %1 : f32 to vector<8x1xf32>
    %41 = arith.mulf %40, %39 : vector<8x1xf32>
    %42 = arith.mulf %41, %3 : vector<8x1xf32>
    %43 = arith.addf %0, %42 : vector<8x1xf32>
    %44 = arith.mulf %41, %5 : vector<8x1xf32>
    %45 = arith.addf %0, %44 : vector<8x1xf32>
    %46 = arith.mulf %41, %7 : vector<8x1xf32>
    %47 = arith.addf %0, %46 : vector<8x1xf32>
    %48 = arith.mulf %41, %9 : vector<8x1xf32>
    %49 = arith.addf %0, %48 : vector<8x1xf32>
    %c13 = arith.constant 13 : index
    %c0_29 = arith.constant 0 : index
    %c0_30 = arith.constant 0 : index
    %50 = vector.load %arg2[%c13, %c0_29, %c0_30] : memref<74x8x1xf32, #tpu.memory_space<vmem>>, vector<1x8x1xf32>
    %51 = vector.shape_cast %50 : vector<1x8x1xf32> to vector<8x1xf32>
    %52 = vector.broadcast %1 : f32 to vector<8x1xf32>
    %53 = arith.mulf %52, %51 : vector<8x1xf32>
    %54 = arith.mulf %53, %11 : vector<8x1xf32>
    %55 = arith.addf %43, %54 : vector<8x1xf32>
    %56 = arith.mulf %53, %13 : vector<8x1xf32>
    %57 = arith.addf %45, %56 : vector<8x1xf32>
    %58 = arith.mulf %53, %15 : vector<8x1xf32>
    %59 = arith.addf %47, %58 : vector<8x1xf32>
    %60 = arith.mulf %53, %17 : vector<8x1xf32>
    %61 = arith.addf %49, %60 : vector<8x1xf32>
    %c14 = arith.constant 14 : index
    %c0_31 = arith.constant 0 : index
    %c0_32 = arith.constant 0 : index
    %62 = vector.load %arg2[%c14, %c0_31, %c0_32] : memref<74x8x1xf32, #tpu.memory_space<vmem>>, vector<1x8x1xf32>
    %63 = vector.shape_cast %62 : vector<1x8x1xf32> to vector<8x1xf32>
    %64 = vector.broadcast %1 : f32 to vector<8x1xf32>
    %65 = arith.mulf %64, %63 : vector<8x1xf32>
    %66 = arith.mulf %65, %19 : vector<8x1xf32>
    %67 = arith.addf %55, %66 : vector<8x1xf32>
    %68 = arith.mulf %65, %21 : vector<8x1xf32>
    %69 = arith.addf %57, %68 : vector<8x1xf32>
    %70 = arith.mulf %65, %23 : vector<8x1xf32>
    %71 = arith.addf %59, %70 : vector<8x1xf32>
    %72 = arith.mulf %65, %25 : vector<8x1xf32>
    %73 = arith.addf %61, %72 : vector<8x1xf32>
    %74 = arith.mulf %3, %67 : vector<8x1xf32>
    %75 = arith.addf %0, %74 : vector<8x1xf32>
    %76 = arith.mulf %3, %69 : vector<8x1xf32>
    %77 = arith.addf %0, %76 : vector<8x1xf32>
    %78 = arith.mulf %3, %71 : vector<8x1xf32>
    %79 = arith.addf %0, %78 : vector<8x1xf32>
    %80 = arith.mulf %3, %73 : vector<8x1xf32>
    %81 = arith.addf %0, %80 : vector<8x1xf32>
    %82 = arith.mulf %5, %67 : vector<8x1xf32>
    %83 = arith.addf %0, %82 : vector<8x1xf32>
    %84 = arith.mulf %5, %69 : vector<8x1xf32>
    %85 = arith.addf %0, %84 : vector<8x1xf32>
    %86 = arith.mulf %5, %71 : vector<8x1xf32>
    %87 = arith.addf %0, %86 : vector<8x1xf32>
    %88 = arith.mulf %5, %73 : vector<8x1xf32>
    %89 = arith.addf %0, %88 : vector<8x1xf32>
    %90 = arith.mulf %7, %67 : vector<8x1xf32>
    %91 = arith.addf %0, %90 : vector<8x1xf32>
    %92 = arith.mulf %7, %69 : vector<8x1xf32>
    %93 = arith.addf %0, %92 : vector<8x1xf32>
    %94 = arith.mulf %7, %71 : vector<8x1xf32>
    %95 = arith.addf %0, %94 : vector<8x1xf32>
    %96 = arith.mulf %7, %73 : vector<8x1xf32>
    %97 = arith.addf %0, %96 : vector<8x1xf32>
    %98 = arith.mulf %9, %67 : vector<8x1xf32>
    %99 = arith.addf %0, %98 : vector<8x1xf32>
    %100 = arith.mulf %9, %69 : vector<8x1xf32>
    %101 = arith.addf %0, %100 : vector<8x1xf32>
    %102 = arith.mulf %9, %71 : vector<8x1xf32>
    %103 = arith.addf %0, %102 : vector<8x1xf32>
    %104 = arith.mulf %9, %73 : vector<8x1xf32>
    %105 = arith.addf %0, %104 : vector<8x1xf32>
    %c19 = arith.constant 19 : index
    %c0_33 = arith.constant 0 : index
    %c0_34 = arith.constant 0 : index
    %106 = vector.load %arg2[%c19, %c0_33, %c0_34] : memref<74x8x1xf32, #tpu.memory_space<vmem>>, vector<1x8x1xf32>
    %107 = vector.shape_cast %106 : vector<1x8x1xf32> to vector<8x1xf32>
    %108 = vector.broadcast %1 : f32 to vector<8x1xf32>
    %109 = arith.mulf %108, %107 : vector<8x1xf32>
    %110 = arith.mulf %109, %11 : vector<8x1xf32>
    %111 = arith.addf %31, %110 : vector<8x1xf32>
    %112 = arith.mulf %109, %13 : vector<8x1xf32>
    %113 = arith.addf %33, %112 : vector<8x1xf32>
    %114 = arith.mulf %109, %15 : vector<8x1xf32>
    %115 = arith.addf %35, %114 : vector<8x1xf32>
    %116 = arith.mulf %109, %17 : vector<8x1xf32>
    %117 = arith.addf %37, %116 : vector<8x1xf32>
    %c16 = arith.constant 16 : index
    %c0_35 = arith.constant 0 : index
    %c0_36 = arith.constant 0 : index
    %118 = vector.load %arg2[%c16, %c0_35, %c0_36] : memref<74x8x1xf32, #tpu.memory_space<vmem>>, vector<1x8x1xf32>
    %119 = vector.shape_cast %118 : vector<1x8x1xf32> to vector<8x1xf32>
    %120 = vector.broadcast %1 : f32 to vector<8x1xf32>
    %121 = arith.mulf %120, %119 : vector<8x1xf32>
    %122 = arith.mulf %121, %3 : vector<8x1xf32>
    %123 = arith.addf %0, %122 : vector<8x1xf32>
    %124 = arith.mulf %121, %5 : vector<8x1xf32>
    %125 = arith.addf %0, %124 : vector<8x1xf32>
    %126 = arith.mulf %121, %7 : vector<8x1xf32>
    %127 = arith.addf %0, %126 : vector<8x1xf32>
    %128 = arith.mulf %121, %9 : vector<8x1xf32>
    %129 = arith.addf %0, %128 : vector<8x1xf32>
    %c17 = arith.constant 17 : index
    %c0_37 = arith.constant 0 : index
    %c0_38 = arith.constant 0 : index
    %130 = vector.load %arg2[%c17, %c0_37, %c0_38] : memref<74x8x1xf32, #tpu.memory_space<vmem>>, vector<1x8x1xf32>
    %131 = vector.shape_cast %130 : vector<1x8x1xf32> to vector<8x1xf32>
    %132 = vector.broadcast %1 : f32 to vector<8x1xf32>
    %133 = arith.mulf %132, %131 : vector<8x1xf32>
    %134 = arith.mulf %133, %11 : vector<8x1xf32>
    %135 = arith.addf %123, %134 : vector<8x1xf32>
    %136 = arith.mulf %133, %13 : vector<8x1xf32>
    %137 = arith.addf %125, %136 : vector<8x1xf32>
    %138 = arith.mulf %133, %15 : vector<8x1xf32>
    %139 = arith.addf %127, %138 : vector<8x1xf32>
    %140 = arith.mulf %133, %17 : vector<8x1xf32>
    %141 = arith.addf %129, %140 : vector<8x1xf32>
    %c18 = arith.constant 18 : index
    %c0_39 = arith.constant 0 : index
    %c0_40 = arith.constant 0 : index
    %142 = vector.load %arg2[%c18, %c0_39, %c0_40] : memref<74x8x1xf32, #tpu.memory_space<vmem>>, vector<1x8x1xf32>
    %143 = vector.shape_cast %142 : vector<1x8x1xf32> to vector<8x1xf32>
    %144 = vector.broadcast %1 : f32 to vector<8x1xf32>
    %145 = arith.mulf %144, %143 : vector<8x1xf32>
    %146 = arith.mulf %145, %19 : vector<8x1xf32>
    %147 = arith.addf %135, %146 : vector<8x1xf32>
    %148 = arith.mulf %145, %21 : vector<8x1xf32>
    %149 = arith.addf %137, %148 : vector<8x1xf32>
    %150 = arith.mulf %145, %23 : vector<8x1xf32>
    %151 = arith.addf %139, %150 : vector<8x1xf32>
    %152 = arith.mulf %145, %25 : vector<8x1xf32>
    %153 = arith.addf %141, %152 : vector<8x1xf32>
    %154 = arith.mulf %11, %147 : vector<8x1xf32>
    %155 = arith.addf %75, %154 : vector<8x1xf32>
    %156 = arith.mulf %11, %149 : vector<8x1xf32>
    %157 = arith.addf %77, %156 : vector<8x1xf32>
    %158 = arith.mulf %11, %151 : vector<8x1xf32>
    %159 = arith.addf %79, %158 : vector<8x1xf32>
    %160 = arith.mulf %11, %153 : vector<8x1xf32>
    %161 = arith.addf %81, %160 : vector<8x1xf32>
    %162 = arith.mulf %13, %147 : vector<8x1xf32>
    %163 = arith.addf %83, %162 : vector<8x1xf32>
    %164 = arith.mulf %13, %149 : vector<8x1xf32>
    %165 = arith.addf %85, %164 : vector<8x1xf32>
    %166 = arith.mulf %13, %151 : vector<8x1xf32>
    %167 = arith.addf %87, %166 : vector<8x1xf32>
    %168 = arith.mulf %13, %153 : vector<8x1xf32>
    %169 = arith.addf %89, %168 : vector<8x1xf32>
    %170 = arith.mulf %15, %147 : vector<8x1xf32>
    %171 = arith.addf %91, %170 : vector<8x1xf32>
    %172 = arith.mulf %15, %149 : vector<8x1xf32>
    %173 = arith.addf %93, %172 : vector<8x1xf32>
    %174 = arith.mulf %15, %151 : vector<8x1xf32>
    %175 = arith.addf %95, %174 : vector<8x1xf32>
    %176 = arith.mulf %15, %153 : vector<8x1xf32>
    %177 = arith.addf %97, %176 : vector<8x1xf32>
    %178 = arith.mulf %17, %147 : vector<8x1xf32>
    %179 = arith.addf %99, %178 : vector<8x1xf32>
    %180 = arith.mulf %17, %149 : vector<8x1xf32>
    %181 = arith.addf %101, %180 : vector<8x1xf32>
    %182 = arith.mulf %17, %151 : vector<8x1xf32>
    %183 = arith.addf %103, %182 : vector<8x1xf32>
    %184 = arith.mulf %17, %153 : vector<8x1xf32>
    %185 = arith.addf %105, %184 : vector<8x1xf32>
    %c23 = arith.constant 23 : index
    %c0_41 = arith.constant 0 : index
    %c0_42 = arith.constant 0 : index
    %186 = vector.load %arg2[%c23, %c0_41, %c0_42] : memref<74x8x1xf32, #tpu.memory_space<vmem>>, vector<1x8x1xf32>
    %187 = vector.shape_cast %186 : vector<1x8x1xf32> to vector<8x1xf32>
    %188 = vector.broadcast %1 : f32 to vector<8x1xf32>
    %189 = arith.mulf %188, %187 : vector<8x1xf32>
    %190 = arith.mulf %189, %19 : vector<8x1xf32>
    %191 = arith.addf %111, %190 : vector<8x1xf32>
    %192 = arith.mulf %189, %21 : vector<8x1xf32>
    %193 = arith.addf %113, %192 : vector<8x1xf32>
    %194 = arith.mulf %189, %23 : vector<8x1xf32>
    %195 = arith.addf %115, %194 : vector<8x1xf32>
    %196 = arith.mulf %189, %25 : vector<8x1xf32>
    %197 = arith.addf %117, %196 : vector<8x1xf32>
    %c20 = arith.constant 20 : index
    %c0_43 = arith.constant 0 : index
    %c0_44 = arith.constant 0 : index
    %198 = vector.load %arg2[%c20, %c0_43, %c0_44] : memref<74x8x1xf32, #tpu.memory_space<vmem>>, vector<1x8x1xf32>
    %199 = vector.shape_cast %198 : vector<1x8x1xf32> to vector<8x1xf32>
    %200 = vector.broadcast %1 : f32 to vector<8x1xf32>
    %201 = arith.mulf %200, %199 : vector<8x1xf32>
    %202 = arith.mulf %201, %3 : vector<8x1xf32>
    %203 = arith.addf %0, %202 : vector<8x1xf32>
    %204 = arith.mulf %201, %5 : vector<8x1xf32>
    %205 = arith.addf %0, %204 : vector<8x1xf32>
    %206 = arith.mulf %201, %7 : vector<8x1xf32>
    %207 = arith.addf %0, %206 : vector<8x1xf32>
    %208 = arith.mulf %201, %9 : vector<8x1xf32>
    %209 = arith.addf %0, %208 : vector<8x1xf32>
    %c21 = arith.constant 21 : index
    %c0_45 = arith.constant 0 : index
    %c0_46 = arith.constant 0 : index
    %210 = vector.load %arg2[%c21, %c0_45, %c0_46] : memref<74x8x1xf32, #tpu.memory_space<vmem>>, vector<1x8x1xf32>
    %211 = vector.shape_cast %210 : vector<1x8x1xf32> to vector<8x1xf32>
    %212 = vector.broadcast %1 : f32 to vector<8x1xf32>
    %213 = arith.mulf %212, %211 : vector<8x1xf32>
    %214 = arith.mulf %213, %11 : vector<8x1xf32>
    %215 = arith.addf %203, %214 : vector<8x1xf32>
    %216 = arith.mulf %213, %13 : vector<8x1xf32>
    %217 = arith.addf %205, %216 : vector<8x1xf32>
    %218 = arith.mulf %213, %15 : vector<8x1xf32>
    %219 = arith.addf %207, %218 : vector<8x1xf32>
    %220 = arith.mulf %213, %17 : vector<8x1xf32>
    %221 = arith.addf %209, %220 : vector<8x1xf32>
    %c22 = arith.constant 22 : index
    %c0_47 = arith.constant 0 : index
    %c0_48 = arith.constant 0 : index
    %222 = vector.load %arg2[%c22, %c0_47, %c0_48] : memref<74x8x1xf32, #tpu.memory_space<vmem>>, vector<1x8x1xf32>
    %223 = vector.shape_cast %222 : vector<1x8x1xf32> to vector<8x1xf32>
    %224 = vector.broadcast %1 : f32 to vector<8x1xf32>
    %225 = arith.mulf %224, %223 : vector<8x1xf32>
    %226 = arith.mulf %225, %19 : vector<8x1xf32>
    %227 = arith.addf %215, %226 : vector<8x1xf32>
    %228 = arith.mulf %225, %21 : vector<8x1xf32>
    %229 = arith.addf %217, %228 : vector<8x1xf32>
    %230 = arith.mulf %225, %23 : vector<8x1xf32>
    %231 = arith.addf %219, %230 : vector<8x1xf32>
    %232 = arith.mulf %225, %25 : vector<8x1xf32>
    %233 = arith.addf %221, %232 : vector<8x1xf32>
    %234 = arith.mulf %19, %227 : vector<8x1xf32>
    %235 = arith.addf %155, %234 : vector<8x1xf32>
    %236 = arith.mulf %19, %229 : vector<8x1xf32>
    %237 = arith.addf %157, %236 : vector<8x1xf32>
    %238 = arith.mulf %19, %231 : vector<8x1xf32>
    %239 = arith.addf %159, %238 : vector<8x1xf32>
    %240 = arith.mulf %19, %233 : vector<8x1xf32>
    %241 = arith.addf %161, %240 : vector<8x1xf32>
    %242 = arith.mulf %21, %227 : vector<8x1xf32>
    %243 = arith.addf %163, %242 : vector<8x1xf32>
    %244 = arith.mulf %21, %229 : vector<8x1xf32>
    %245 = arith.addf %165, %244 : vector<8x1xf32>
    %246 = arith.mulf %21, %231 : vector<8x1xf32>
    %247 = arith.addf %167, %246 : vector<8x1xf32>
    %248 = arith.mulf %21, %233 : vector<8x1xf32>
    %249 = arith.addf %169, %248 : vector<8x1xf32>
    %250 = arith.mulf %23, %227 : vector<8x1xf32>
    %251 = arith.addf %171, %250 : vector<8x1xf32>
    %252 = arith.mulf %23, %229 : vector<8x1xf32>
    %253 = arith.addf %173, %252 : vector<8x1xf32>
    %254 = arith.mulf %23, %231 : vector<8x1xf32>
    %255 = arith.addf %175, %254 : vector<8x1xf32>
    %256 = arith.mulf %23, %233 : vector<8x1xf32>
    %257 = arith.addf %177, %256 : vector<8x1xf32>
    %258 = arith.mulf %25, %227 : vector<8x1xf32>
    %259 = arith.addf %179, %258 : vector<8x1xf32>
    %260 = arith.mulf %25, %229 : vector<8x1xf32>
    %261 = arith.addf %181, %260 : vector<8x1xf32>
    %262 = arith.mulf %25, %231 : vector<8x1xf32>
    %263 = arith.addf %183, %262 : vector<8x1xf32>
    %264 = arith.mulf %25, %233 : vector<8x1xf32>
    %265 = arith.addf %185, %264 : vector<8x1xf32>
    %c1_49 = arith.constant 1 : index
    %266 = memref.load %arg1[%c1_49] : memref<3xf32, #tpu.memory_space<smem>>
    %c24 = arith.constant 24 : index
    %c0_50 = arith.constant 0 : index
    %c0_51 = arith.constant 0 : index
    %267 = vector.load %arg2[%c24, %c0_50, %c0_51] : memref<74x8x1xf32, #tpu.memory_space<vmem>>, vector<1x8x1xf32>
    %268 = vector.shape_cast %267 : vector<1x8x1xf32> to vector<8x1xf32>
    %c25 = arith.constant 25 : index
    %c0_52 = arith.constant 0 : index
    %c0_53 = arith.constant 0 : index
    %269 = vector.load %arg2[%c25, %c0_52, %c0_53] : memref<74x8x1xf32, #tpu.memory_space<vmem>>, vector<1x8x1xf32>
    %270 = vector.shape_cast %269 : vector<1x8x1xf32> to vector<8x1xf32>
    %c26 = arith.constant 26 : index
    %c0_54 = arith.constant 0 : index
    %c0_55 = arith.constant 0 : index
    %271 = vector.load %arg2[%c26, %c0_54, %c0_55] : memref<74x8x1xf32, #tpu.memory_space<vmem>>, vector<1x8x1xf32>
    %272 = vector.shape_cast %271 : vector<1x8x1xf32> to vector<8x1xf32>
    %c27 = arith.constant 27 : index
    %c0_56 = arith.constant 0 : index
    %c0_57 = arith.constant 0 : index
    %273 = vector.load %arg2[%c27, %c0_56, %c0_57] : memref<74x8x1xf32, #tpu.memory_space<vmem>>, vector<1x8x1xf32>
    %274 = vector.shape_cast %273 : vector<1x8x1xf32> to vector<8x1xf32>
    %c28 = arith.constant 28 : index
    %c0_58 = arith.constant 0 : index
    %c0_59 = arith.constant 0 : index
    %275 = vector.load %arg2[%c28, %c0_58, %c0_59] : memref<74x8x1xf32, #tpu.memory_space<vmem>>, vector<1x8x1xf32>
    %276 = vector.shape_cast %275 : vector<1x8x1xf32> to vector<8x1xf32>
    %c29 = arith.constant 29 : index
    %c0_60 = arith.constant 0 : index
    %c0_61 = arith.constant 0 : index
    %277 = vector.load %arg2[%c29, %c0_60, %c0_61] : memref<74x8x1xf32, #tpu.memory_space<vmem>>, vector<1x8x1xf32>
    %278 = vector.shape_cast %277 : vector<1x8x1xf32> to vector<8x1xf32>
    %c30 = arith.constant 30 : index
    %c0_62 = arith.constant 0 : index
    %c0_63 = arith.constant 0 : index
    %279 = vector.load %arg2[%c30, %c0_62, %c0_63] : memref<74x8x1xf32, #tpu.memory_space<vmem>>, vector<1x8x1xf32>
    %280 = vector.shape_cast %279 : vector<1x8x1xf32> to vector<8x1xf32>
    %c31 = arith.constant 31 : index
    %c0_64 = arith.constant 0 : index
    %c0_65 = arith.constant 0 : index
    %281 = vector.load %arg2[%c31, %c0_64, %c0_65] : memref<74x8x1xf32, #tpu.memory_space<vmem>>, vector<1x8x1xf32>
    %282 = vector.shape_cast %281 : vector<1x8x1xf32> to vector<8x1xf32>
    %c32 = arith.constant 32 : index
    %c0_66 = arith.constant 0 : index
    %c0_67 = arith.constant 0 : index
    %283 = vector.load %arg2[%c32, %c0_66, %c0_67] : memref<74x8x1xf32, #tpu.memory_space<vmem>>, vector<1x8x1xf32>
    %284 = vector.shape_cast %283 : vector<1x8x1xf32> to vector<8x1xf32>
    %c33 = arith.constant 33 : index
    %c0_68 = arith.constant 0 : index
    %c0_69 = arith.constant 0 : index
    %285 = vector.load %arg2[%c33, %c0_68, %c0_69] : memref<74x8x1xf32, #tpu.memory_space<vmem>>, vector<1x8x1xf32>
    %286 = vector.shape_cast %285 : vector<1x8x1xf32> to vector<8x1xf32>
    %c34 = arith.constant 34 : index
    %c0_70 = arith.constant 0 : index
    %c0_71 = arith.constant 0 : index
    %287 = vector.load %arg2[%c34, %c0_70, %c0_71] : memref<74x8x1xf32, #tpu.memory_space<vmem>>, vector<1x8x1xf32>
    %288 = vector.shape_cast %287 : vector<1x8x1xf32> to vector<8x1xf32>
    %c35 = arith.constant 35 : index
    %c0_72 = arith.constant 0 : index
    %c0_73 = arith.constant 0 : index
    %289 = vector.load %arg2[%c35, %c0_72, %c0_73] : memref<74x8x1xf32, #tpu.memory_space<vmem>>, vector<1x8x1xf32>
    %290 = vector.shape_cast %289 : vector<1x8x1xf32> to vector<8x1xf32>
    %c36 = arith.constant 36 : index
    %c0_74 = arith.constant 0 : index
    %c0_75 = arith.constant 0 : index
    %291 = vector.load %arg2[%c36, %c0_74, %c0_75] : memref<74x8x1xf32, #tpu.memory_space<vmem>>, vector<1x8x1xf32>
    %292 = vector.shape_cast %291 : vector<1x8x1xf32> to vector<8x1xf32>
    %c37 = arith.constant 37 : index
    %c0_76 = arith.constant 0 : index
    %c0_77 = arith.constant 0 : index
    %293 = vector.load %arg2[%c37, %c0_76, %c0_77] : memref<74x8x1xf32, #tpu.memory_space<vmem>>, vector<1x8x1xf32>
    %294 = vector.shape_cast %293 : vector<1x8x1xf32> to vector<8x1xf32>
    %c38 = arith.constant 38 : index
    %c0_78 = arith.constant 0 : index
    %c0_79 = arith.constant 0 : index
    %295 = vector.load %arg2[%c38, %c0_78, %c0_79] : memref<74x8x1xf32, #tpu.memory_space<vmem>>, vector<1x8x1xf32>
    %296 = vector.shape_cast %295 : vector<1x8x1xf32> to vector<8x1xf32>
    %c39 = arith.constant 39 : index
    %c0_80 = arith.constant 0 : index
    %c0_81 = arith.constant 0 : index
    %297 = vector.load %arg2[%c39, %c0_80, %c0_81] : memref<74x8x1xf32, #tpu.memory_space<vmem>>, vector<1x8x1xf32>
    %298 = vector.shape_cast %297 : vector<1x8x1xf32> to vector<8x1xf32>
    %c44 = arith.constant 44 : index
    %c0_82 = arith.constant 0 : index
    %c0_83 = arith.constant 0 : index
    %299 = vector.load %arg2[%c44, %c0_82, %c0_83] : memref<74x8x1xf32, #tpu.memory_space<vmem>>, vector<1x8x1xf32>
    %300 = vector.shape_cast %299 : vector<1x8x1xf32> to vector<8x1xf32>
    %301 = vector.broadcast %266 : f32 to vector<8x1xf32>
    %302 = arith.mulf %301, %300 : vector<8x1xf32>
    %303 = arith.mulf %302, %268 : vector<8x1xf32>
    %304 = arith.addf %191, %303 : vector<8x1xf32>
    %305 = arith.mulf %302, %270 : vector<8x1xf32>
    %306 = arith.addf %193, %305 : vector<8x1xf32>
    %307 = arith.mulf %302, %272 : vector<8x1xf32>
    %308 = arith.addf %195, %307 : vector<8x1xf32>
    %309 = arith.mulf %302, %274 : vector<8x1xf32>
    %310 = arith.addf %197, %309 : vector<8x1xf32>
    %c40 = arith.constant 40 : index
    %c0_84 = arith.constant 0 : index
    %c0_85 = arith.constant 0 : index
    %311 = vector.load %arg2[%c40, %c0_84, %c0_85] : memref<74x8x1xf32, #tpu.memory_space<vmem>>, vector<1x8x1xf32>
    %312 = vector.shape_cast %311 : vector<1x8x1xf32> to vector<8x1xf32>
    %313 = vector.broadcast %266 : f32 to vector<8x1xf32>
    %314 = arith.mulf %313, %312 : vector<8x1xf32>
    %315 = arith.mulf %314, %268 : vector<8x1xf32>
    %316 = arith.addf %0, %315 : vector<8x1xf32>
    %317 = arith.mulf %314, %270 : vector<8x1xf32>
    %318 = arith.addf %0, %317 : vector<8x1xf32>
    %319 = arith.mulf %314, %272 : vector<8x1xf32>
    %320 = arith.addf %0, %319 : vector<8x1xf32>
    %321 = arith.mulf %314, %274 : vector<8x1xf32>
    %322 = arith.addf %0, %321 : vector<8x1xf32>
    %c41 = arith.constant 41 : index
    %c0_86 = arith.constant 0 : index
    %c0_87 = arith.constant 0 : index
    %323 = vector.load %arg2[%c41, %c0_86, %c0_87] : memref<74x8x1xf32, #tpu.memory_space<vmem>>, vector<1x8x1xf32>
    %324 = vector.shape_cast %323 : vector<1x8x1xf32> to vector<8x1xf32>
    %325 = vector.broadcast %266 : f32 to vector<8x1xf32>
    %326 = arith.mulf %325, %324 : vector<8x1xf32>
    %327 = arith.mulf %326, %276 : vector<8x1xf32>
    %328 = arith.addf %316, %327 : vector<8x1xf32>
    %329 = arith.mulf %326, %278 : vector<8x1xf32>
    %330 = arith.addf %318, %329 : vector<8x1xf32>
    %331 = arith.mulf %326, %280 : vector<8x1xf32>
    %332 = arith.addf %320, %331 : vector<8x1xf32>
    %333 = arith.mulf %326, %282 : vector<8x1xf32>
    %334 = arith.addf %322, %333 : vector<8x1xf32>
    %c42 = arith.constant 42 : index
    %c0_88 = arith.constant 0 : index
    %c0_89 = arith.constant 0 : index
    %335 = vector.load %arg2[%c42, %c0_88, %c0_89] : memref<74x8x1xf32, #tpu.memory_space<vmem>>, vector<1x8x1xf32>
    %336 = vector.shape_cast %335 : vector<1x8x1xf32> to vector<8x1xf32>
    %337 = vector.broadcast %266 : f32 to vector<8x1xf32>
    %338 = arith.mulf %337, %336 : vector<8x1xf32>
    %339 = arith.mulf %338, %284 : vector<8x1xf32>
    %340 = arith.addf %328, %339 : vector<8x1xf32>
    %341 = arith.mulf %338, %286 : vector<8x1xf32>
    %342 = arith.addf %330, %341 : vector<8x1xf32>
    %343 = arith.mulf %338, %288 : vector<8x1xf32>
    %344 = arith.addf %332, %343 : vector<8x1xf32>
    %345 = arith.mulf %338, %290 : vector<8x1xf32>
    %346 = arith.addf %334, %345 : vector<8x1xf32>
    %c43 = arith.constant 43 : index
    %c0_90 = arith.constant 0 : index
    %c0_91 = arith.constant 0 : index
    %347 = vector.load %arg2[%c43, %c0_90, %c0_91] : memref<74x8x1xf32, #tpu.memory_space<vmem>>, vector<1x8x1xf32>
    %348 = vector.shape_cast %347 : vector<1x8x1xf32> to vector<8x1xf32>
    %349 = vector.broadcast %266 : f32 to vector<8x1xf32>
    %350 = arith.mulf %349, %348 : vector<8x1xf32>
    %351 = arith.mulf %350, %292 : vector<8x1xf32>
    %352 = arith.addf %340, %351 : vector<8x1xf32>
    %353 = arith.mulf %350, %294 : vector<8x1xf32>
    %354 = arith.addf %342, %353 : vector<8x1xf32>
    %355 = arith.mulf %350, %296 : vector<8x1xf32>
    %356 = arith.addf %344, %355 : vector<8x1xf32>
    %357 = arith.mulf %350, %298 : vector<8x1xf32>
    %358 = arith.addf %346, %357 : vector<8x1xf32>
    %359 = arith.mulf %268, %352 : vector<8x1xf32>
    %360 = arith.addf %235, %359 : vector<8x1xf32>
    %361 = arith.mulf %268, %354 : vector<8x1xf32>
    %362 = arith.addf %237, %361 : vector<8x1xf32>
    %363 = arith.mulf %268, %356 : vector<8x1xf32>
    %364 = arith.addf %239, %363 : vector<8x1xf32>
    %365 = arith.mulf %268, %358 : vector<8x1xf32>
    %366 = arith.addf %241, %365 : vector<8x1xf32>
    %367 = arith.mulf %270, %352 : vector<8x1xf32>
    %368 = arith.addf %243, %367 : vector<8x1xf32>
    %369 = arith.mulf %270, %354 : vector<8x1xf32>
    %370 = arith.addf %245, %369 : vector<8x1xf32>
    %371 = arith.mulf %270, %356 : vector<8x1xf32>
    %372 = arith.addf %247, %371 : vector<8x1xf32>
    %373 = arith.mulf %270, %358 : vector<8x1xf32>
    %374 = arith.addf %249, %373 : vector<8x1xf32>
    %375 = arith.mulf %272, %352 : vector<8x1xf32>
    %376 = arith.addf %251, %375 : vector<8x1xf32>
    %377 = arith.mulf %272, %354 : vector<8x1xf32>
    %378 = arith.addf %253, %377 : vector<8x1xf32>
    %379 = arith.mulf %272, %356 : vector<8x1xf32>
    %380 = arith.addf %255, %379 : vector<8x1xf32>
    %381 = arith.mulf %272, %358 : vector<8x1xf32>
    %382 = arith.addf %257, %381 : vector<8x1xf32>
    %383 = arith.mulf %274, %352 : vector<8x1xf32>
    %384 = arith.addf %259, %383 : vector<8x1xf32>
    %385 = arith.mulf %274, %354 : vector<8x1xf32>
    %386 = arith.addf %261, %385 : vector<8x1xf32>
    %387 = arith.mulf %274, %356 : vector<8x1xf32>
    %388 = arith.addf %263, %387 : vector<8x1xf32>
    %389 = arith.mulf %274, %358 : vector<8x1xf32>
    %390 = arith.addf %265, %389 : vector<8x1xf32>
    %c49 = arith.constant 49 : index
    %c0_92 = arith.constant 0 : index
    %c0_93 = arith.constant 0 : index
    %391 = vector.load %arg2[%c49, %c0_92, %c0_93] : memref<74x8x1xf32, #tpu.memory_space<vmem>>, vector<1x8x1xf32>
    %392 = vector.shape_cast %391 : vector<1x8x1xf32> to vector<8x1xf32>
    %393 = vector.broadcast %266 : f32 to vector<8x1xf32>
    %394 = arith.mulf %393, %392 : vector<8x1xf32>
    %395 = arith.mulf %394, %276 : vector<8x1xf32>
    %396 = arith.addf %304, %395 : vector<8x1xf32>
    %397 = arith.mulf %394, %278 : vector<8x1xf32>
    %398 = arith.addf %306, %397 : vector<8x1xf32>
    %399 = arith.mulf %394, %280 : vector<8x1xf32>
    %400 = arith.addf %308, %399 : vector<8x1xf32>
    %401 = arith.mulf %394, %282 : vector<8x1xf32>
    %402 = arith.addf %310, %401 : vector<8x1xf32>
    %c45 = arith.constant 45 : index
    %c0_94 = arith.constant 0 : index
    %c0_95 = arith.constant 0 : index
    %403 = vector.load %arg2[%c45, %c0_94, %c0_95] : memref<74x8x1xf32, #tpu.memory_space<vmem>>, vector<1x8x1xf32>
    %404 = vector.shape_cast %403 : vector<1x8x1xf32> to vector<8x1xf32>
    %405 = vector.broadcast %266 : f32 to vector<8x1xf32>
    %406 = arith.mulf %405, %404 : vector<8x1xf32>
    %407 = arith.mulf %406, %268 : vector<8x1xf32>
    %408 = arith.addf %0, %407 : vector<8x1xf32>
    %409 = arith.mulf %406, %270 : vector<8x1xf32>
    %410 = arith.addf %0, %409 : vector<8x1xf32>
    %411 = arith.mulf %406, %272 : vector<8x1xf32>
    %412 = arith.addf %0, %411 : vector<8x1xf32>
    %413 = arith.mulf %406, %274 : vector<8x1xf32>
    %414 = arith.addf %0, %413 : vector<8x1xf32>
    %c46 = arith.constant 46 : index
    %c0_96 = arith.constant 0 : index
    %c0_97 = arith.constant 0 : index
    %415 = vector.load %arg2[%c46, %c0_96, %c0_97] : memref<74x8x1xf32, #tpu.memory_space<vmem>>, vector<1x8x1xf32>
    %416 = vector.shape_cast %415 : vector<1x8x1xf32> to vector<8x1xf32>
    %417 = vector.broadcast %266 : f32 to vector<8x1xf32>
    %418 = arith.mulf %417, %416 : vector<8x1xf32>
    %419 = arith.mulf %418, %276 : vector<8x1xf32>
    %420 = arith.addf %408, %419 : vector<8x1xf32>
    %421 = arith.mulf %418, %278 : vector<8x1xf32>
    %422 = arith.addf %410, %421 : vector<8x1xf32>
    %423 = arith.mulf %418, %280 : vector<8x1xf32>
    %424 = arith.addf %412, %423 : vector<8x1xf32>
    %425 = arith.mulf %418, %282 : vector<8x1xf32>
    %426 = arith.addf %414, %425 : vector<8x1xf32>
    %c47 = arith.constant 47 : index
    %c0_98 = arith.constant 0 : index
    %c0_99 = arith.constant 0 : index
    %427 = vector.load %arg2[%c47, %c0_98, %c0_99] : memref<74x8x1xf32, #tpu.memory_space<vmem>>, vector<1x8x1xf32>
    %428 = vector.shape_cast %427 : vector<1x8x1xf32> to vector<8x1xf32>
    %429 = vector.broadcast %266 : f32 to vector<8x1xf32>
    %430 = arith.mulf %429, %428 : vector<8x1xf32>
    %431 = arith.mulf %430, %284 : vector<8x1xf32>
    %432 = arith.addf %420, %431 : vector<8x1xf32>
    %433 = arith.mulf %430, %286 : vector<8x1xf32>
    %434 = arith.addf %422, %433 : vector<8x1xf32>
    %435 = arith.mulf %430, %288 : vector<8x1xf32>
    %436 = arith.addf %424, %435 : vector<8x1xf32>
    %437 = arith.mulf %430, %290 : vector<8x1xf32>
    %438 = arith.addf %426, %437 : vector<8x1xf32>
    %c48 = arith.constant 48 : index
    %c0_100 = arith.constant 0 : index
    %c0_101 = arith.constant 0 : index
    %439 = vector.load %arg2[%c48, %c0_100, %c0_101] : memref<74x8x1xf32, #tpu.memory_space<vmem>>, vector<1x8x1xf32>
    %440 = vector.shape_cast %439 : vector<1x8x1xf32> to vector<8x1xf32>
    %441 = vector.broadcast %266 : f32 to vector<8x1xf32>
    %442 = arith.mulf %441, %440 : vector<8x1xf32>
    %443 = arith.mulf %442, %292 : vector<8x1xf32>
    %444 = arith.addf %432, %443 : vector<8x1xf32>
    %445 = arith.mulf %442, %294 : vector<8x1xf32>
    %446 = arith.addf %434, %445 : vector<8x1xf32>
    %447 = arith.mulf %442, %296 : vector<8x1xf32>
    %448 = arith.addf %436, %447 : vector<8x1xf32>
    %449 = arith.mulf %442, %298 : vector<8x1xf32>
    %450 = arith.addf %438, %449 : vector<8x1xf32>
    %451 = arith.mulf %276, %444 : vector<8x1xf32>
    %452 = arith.addf %360, %451 : vector<8x1xf32>
    %453 = arith.mulf %276, %446 : vector<8x1xf32>
    %454 = arith.addf %362, %453 : vector<8x1xf32>
    %455 = arith.mulf %276, %448 : vector<8x1xf32>
    %456 = arith.addf %364, %455 : vector<8x1xf32>
    %457 = arith.mulf %276, %450 : vector<8x1xf32>
    %458 = arith.addf %366, %457 : vector<8x1xf32>
    %459 = arith.mulf %278, %444 : vector<8x1xf32>
    %460 = arith.addf %368, %459 : vector<8x1xf32>
    %461 = arith.mulf %278, %446 : vector<8x1xf32>
    %462 = arith.addf %370, %461 : vector<8x1xf32>
    %463 = arith.mulf %278, %448 : vector<8x1xf32>
    %464 = arith.addf %372, %463 : vector<8x1xf32>
    %465 = arith.mulf %278, %450 : vector<8x1xf32>
    %466 = arith.addf %374, %465 : vector<8x1xf32>
    %467 = arith.mulf %280, %444 : vector<8x1xf32>
    %468 = arith.addf %376, %467 : vector<8x1xf32>
    %469 = arith.mulf %280, %446 : vector<8x1xf32>
    %470 = arith.addf %378, %469 : vector<8x1xf32>
    %471 = arith.mulf %280, %448 : vector<8x1xf32>
    %472 = arith.addf %380, %471 : vector<8x1xf32>
    %473 = arith.mulf %280, %450 : vector<8x1xf32>
    %474 = arith.addf %382, %473 : vector<8x1xf32>
    %475 = arith.mulf %282, %444 : vector<8x1xf32>
    %476 = arith.addf %384, %475 : vector<8x1xf32>
    %477 = arith.mulf %282, %446 : vector<8x1xf32>
    %478 = arith.addf %386, %477 : vector<8x1xf32>
    %479 = arith.mulf %282, %448 : vector<8x1xf32>
    %480 = arith.addf %388, %479 : vector<8x1xf32>
    %481 = arith.mulf %282, %450 : vector<8x1xf32>
    %482 = arith.addf %390, %481 : vector<8x1xf32>
    %c54 = arith.constant 54 : index
    %c0_102 = arith.constant 0 : index
    %c0_103 = arith.constant 0 : index
    %483 = vector.load %arg2[%c54, %c0_102, %c0_103] : memref<74x8x1xf32, #tpu.memory_space<vmem>>, vector<1x8x1xf32>
    %484 = vector.shape_cast %483 : vector<1x8x1xf32> to vector<8x1xf32>
    %485 = vector.broadcast %266 : f32 to vector<8x1xf32>
    %486 = arith.mulf %485, %484 : vector<8x1xf32>
    %487 = arith.mulf %486, %284 : vector<8x1xf32>
    %488 = arith.addf %396, %487 : vector<8x1xf32>
    %489 = arith.mulf %486, %286 : vector<8x1xf32>
    %490 = arith.addf %398, %489 : vector<8x1xf32>
    %491 = arith.mulf %486, %288 : vector<8x1xf32>
    %492 = arith.addf %400, %491 : vector<8x1xf32>
    %493 = arith.mulf %486, %290 : vector<8x1xf32>
    %494 = arith.addf %402, %493 : vector<8x1xf32>
    %c50 = arith.constant 50 : index
    %c0_104 = arith.constant 0 : index
    %c0_105 = arith.constant 0 : index
    %495 = vector.load %arg2[%c50, %c0_104, %c0_105] : memref<74x8x1xf32, #tpu.memory_space<vmem>>, vector<1x8x1xf32>
    %496 = vector.shape_cast %495 : vector<1x8x1xf32> to vector<8x1xf32>
    %497 = vector.broadcast %266 : f32 to vector<8x1xf32>
    %498 = arith.mulf %497, %496 : vector<8x1xf32>
    %499 = arith.mulf %498, %268 : vector<8x1xf32>
    %500 = arith.addf %0, %499 : vector<8x1xf32>
    %501 = arith.mulf %498, %270 : vector<8x1xf32>
    %502 = arith.addf %0, %501 : vector<8x1xf32>
    %503 = arith.mulf %498, %272 : vector<8x1xf32>
    %504 = arith.addf %0, %503 : vector<8x1xf32>
    %505 = arith.mulf %498, %274 : vector<8x1xf32>
    %506 = arith.addf %0, %505 : vector<8x1xf32>
    %c51 = arith.constant 51 : index
    %c0_106 = arith.constant 0 : index
    %c0_107 = arith.constant 0 : index
    %507 = vector.load %arg2[%c51, %c0_106, %c0_107] : memref<74x8x1xf32, #tpu.memory_space<vmem>>, vector<1x8x1xf32>
    %508 = vector.shape_cast %507 : vector<1x8x1xf32> to vector<8x1xf32>
    %509 = vector.broadcast %266 : f32 to vector<8x1xf32>
    %510 = arith.mulf %509, %508 : vector<8x1xf32>
    %511 = arith.mulf %510, %276 : vector<8x1xf32>
    %512 = arith.addf %500, %511 : vector<8x1xf32>
    %513 = arith.mulf %510, %278 : vector<8x1xf32>
    %514 = arith.addf %502, %513 : vector<8x1xf32>
    %515 = arith.mulf %510, %280 : vector<8x1xf32>
    %516 = arith.addf %504, %515 : vector<8x1xf32>
    %517 = arith.mulf %510, %282 : vector<8x1xf32>
    %518 = arith.addf %506, %517 : vector<8x1xf32>
    %c52 = arith.constant 52 : index
    %c0_108 = arith.constant 0 : index
    %c0_109 = arith.constant 0 : index
    %519 = vector.load %arg2[%c52, %c0_108, %c0_109] : memref<74x8x1xf32, #tpu.memory_space<vmem>>, vector<1x8x1xf32>
    %520 = vector.shape_cast %519 : vector<1x8x1xf32> to vector<8x1xf32>
    %521 = vector.broadcast %266 : f32 to vector<8x1xf32>
    %522 = arith.mulf %521, %520 : vector<8x1xf32>
    %523 = arith.mulf %522, %284 : vector<8x1xf32>
    %524 = arith.addf %512, %523 : vector<8x1xf32>
    %525 = arith.mulf %522, %286 : vector<8x1xf32>
    %526 = arith.addf %514, %525 : vector<8x1xf32>
    %527 = arith.mulf %522, %288 : vector<8x1xf32>
    %528 = arith.addf %516, %527 : vector<8x1xf32>
    %529 = arith.mulf %522, %290 : vector<8x1xf32>
    %530 = arith.addf %518, %529 : vector<8x1xf32>
    %c53 = arith.constant 53 : index
    %c0_110 = arith.constant 0 : index
    %c0_111 = arith.constant 0 : index
    %531 = vector.load %arg2[%c53, %c0_110, %c0_111] : memref<74x8x1xf32, #tpu.memory_space<vmem>>, vector<1x8x1xf32>
    %532 = vector.shape_cast %531 : vector<1x8x1xf32> to vector<8x1xf32>
    %533 = vector.broadcast %266 : f32 to vector<8x1xf32>
    %534 = arith.mulf %533, %532 : vector<8x1xf32>
    %535 = arith.mulf %534, %292 : vector<8x1xf32>
    %536 = arith.addf %524, %535 : vector<8x1xf32>
    %537 = arith.mulf %534, %294 : vector<8x1xf32>
    %538 = arith.addf %526, %537 : vector<8x1xf32>
    %539 = arith.mulf %534, %296 : vector<8x1xf32>
    %540 = arith.addf %528, %539 : vector<8x1xf32>
    %541 = arith.mulf %534, %298 : vector<8x1xf32>
    %542 = arith.addf %530, %541 : vector<8x1xf32>
    %543 = arith.mulf %284, %536 : vector<8x1xf32>
    %544 = arith.addf %452, %543 : vector<8x1xf32>
    %545 = arith.mulf %284, %538 : vector<8x1xf32>
    %546 = arith.addf %454, %545 : vector<8x1xf32>
    %547 = arith.mulf %284, %540 : vector<8x1xf32>
    %548 = arith.addf %456, %547 : vector<8x1xf32>
    %549 = arith.mulf %284, %542 : vector<8x1xf32>
    %550 = arith.addf %458, %549 : vector<8x1xf32>
    %551 = arith.mulf %286, %536 : vector<8x1xf32>
    %552 = arith.addf %460, %551 : vector<8x1xf32>
    %553 = arith.mulf %286, %538 : vector<8x1xf32>
    %554 = arith.addf %462, %553 : vector<8x1xf32>
    %555 = arith.mulf %286, %540 : vector<8x1xf32>
    %556 = arith.addf %464, %555 : vector<8x1xf32>
    %557 = arith.mulf %286, %542 : vector<8x1xf32>
    %558 = arith.addf %466, %557 : vector<8x1xf32>
    %559 = arith.mulf %288, %536 : vector<8x1xf32>
    %560 = arith.addf %468, %559 : vector<8x1xf32>
    %561 = arith.mulf %288, %538 : vector<8x1xf32>
    %562 = arith.addf %470, %561 : vector<8x1xf32>
    %563 = arith.mulf %288, %540 : vector<8x1xf32>
    %564 = arith.addf %472, %563 : vector<8x1xf32>
    %565 = arith.mulf %288, %542 : vector<8x1xf32>
    %566 = arith.addf %474, %565 : vector<8x1xf32>
    %567 = arith.mulf %290, %536 : vector<8x1xf32>
    %568 = arith.addf %476, %567 : vector<8x1xf32>
    %569 = arith.mulf %290, %538 : vector<8x1xf32>
    %570 = arith.addf %478, %569 : vector<8x1xf32>
    %571 = arith.mulf %290, %540 : vector<8x1xf32>
    %572 = arith.addf %480, %571 : vector<8x1xf32>
    %573 = arith.mulf %290, %542 : vector<8x1xf32>
    %574 = arith.addf %482, %573 : vector<8x1xf32>
    %c59 = arith.constant 59 : index
    %c0_112 = arith.constant 0 : index
    %c0_113 = arith.constant 0 : index
    %575 = vector.load %arg2[%c59, %c0_112, %c0_113] : memref<74x8x1xf32, #tpu.memory_space<vmem>>, vector<1x8x1xf32>
    %576 = vector.shape_cast %575 : vector<1x8x1xf32> to vector<8x1xf32>
    %577 = vector.broadcast %266 : f32 to vector<8x1xf32>
    %578 = arith.mulf %577, %576 : vector<8x1xf32>
    %579 = arith.mulf %578, %292 : vector<8x1xf32>
    %580 = arith.addf %488, %579 : vector<8x1xf32>
    %581 = arith.mulf %578, %294 : vector<8x1xf32>
    %582 = arith.addf %490, %581 : vector<8x1xf32>
    %583 = arith.mulf %578, %296 : vector<8x1xf32>
    %584 = arith.addf %492, %583 : vector<8x1xf32>
    %585 = arith.mulf %578, %298 : vector<8x1xf32>
    %586 = arith.addf %494, %585 : vector<8x1xf32>
    %c55 = arith.constant 55 : index
    %c0_114 = arith.constant 0 : index
    %c0_115 = arith.constant 0 : index
    %587 = vector.load %arg2[%c55, %c0_114, %c0_115] : memref<74x8x1xf32, #tpu.memory_space<vmem>>, vector<1x8x1xf32>
    %588 = vector.shape_cast %587 : vector<1x8x1xf32> to vector<8x1xf32>
    %589 = vector.broadcast %266 : f32 to vector<8x1xf32>
    %590 = arith.mulf %589, %588 : vector<8x1xf32>
    %591 = arith.mulf %590, %268 : vector<8x1xf32>
    %592 = arith.addf %0, %591 : vector<8x1xf32>
    %593 = arith.mulf %590, %270 : vector<8x1xf32>
    %594 = arith.addf %0, %593 : vector<8x1xf32>
    %595 = arith.mulf %590, %272 : vector<8x1xf32>
    %596 = arith.addf %0, %595 : vector<8x1xf32>
    %597 = arith.mulf %590, %274 : vector<8x1xf32>
    %598 = arith.addf %0, %597 : vector<8x1xf32>
    %c56 = arith.constant 56 : index
    %c0_116 = arith.constant 0 : index
    %c0_117 = arith.constant 0 : index
    %599 = vector.load %arg2[%c56, %c0_116, %c0_117] : memref<74x8x1xf32, #tpu.memory_space<vmem>>, vector<1x8x1xf32>
    %600 = vector.shape_cast %599 : vector<1x8x1xf32> to vector<8x1xf32>
    %601 = vector.broadcast %266 : f32 to vector<8x1xf32>
    %602 = arith.mulf %601, %600 : vector<8x1xf32>
    %603 = arith.mulf %602, %276 : vector<8x1xf32>
    %604 = arith.addf %592, %603 : vector<8x1xf32>
    %605 = arith.mulf %602, %278 : vector<8x1xf32>
    %606 = arith.addf %594, %605 : vector<8x1xf32>
    %607 = arith.mulf %602, %280 : vector<8x1xf32>
    %608 = arith.addf %596, %607 : vector<8x1xf32>
    %609 = arith.mulf %602, %282 : vector<8x1xf32>
    %610 = arith.addf %598, %609 : vector<8x1xf32>
    %c57 = arith.constant 57 : index
    %c0_118 = arith.constant 0 : index
    %c0_119 = arith.constant 0 : index
    %611 = vector.load %arg2[%c57, %c0_118, %c0_119] : memref<74x8x1xf32, #tpu.memory_space<vmem>>, vector<1x8x1xf32>
    %612 = vector.shape_cast %611 : vector<1x8x1xf32> to vector<8x1xf32>
    %613 = vector.broadcast %266 : f32 to vector<8x1xf32>
    %614 = arith.mulf %613, %612 : vector<8x1xf32>
    %615 = arith.mulf %614, %284 : vector<8x1xf32>
    %616 = arith.addf %604, %615 : vector<8x1xf32>
    %617 = arith.mulf %614, %286 : vector<8x1xf32>
    %618 = arith.addf %606, %617 : vector<8x1xf32>
    %619 = arith.mulf %614, %288 : vector<8x1xf32>
    %620 = arith.addf %608, %619 : vector<8x1xf32>
    %621 = arith.mulf %614, %290 : vector<8x1xf32>
    %622 = arith.addf %610, %621 : vector<8x1xf32>
    %c58 = arith.constant 58 : index
    %c0_120 = arith.constant 0 : index
    %c0_121 = arith.constant 0 : index
    %623 = vector.load %arg2[%c58, %c0_120, %c0_121] : memref<74x8x1xf32, #tpu.memory_space<vmem>>, vector<1x8x1xf32>
    %624 = vector.shape_cast %623 : vector<1x8x1xf32> to vector<8x1xf32>
    %625 = vector.broadcast %266 : f32 to vector<8x1xf32>
    %626 = arith.mulf %625, %624 : vector<8x1xf32>
    %627 = arith.mulf %626, %292 : vector<8x1xf32>
    %628 = arith.addf %616, %627 : vector<8x1xf32>
    %629 = arith.mulf %626, %294 : vector<8x1xf32>
    %630 = arith.addf %618, %629 : vector<8x1xf32>
    %631 = arith.mulf %626, %296 : vector<8x1xf32>
    %632 = arith.addf %620, %631 : vector<8x1xf32>
    %633 = arith.mulf %626, %298 : vector<8x1xf32>
    %634 = arith.addf %622, %633 : vector<8x1xf32>
    %635 = arith.mulf %292, %628 : vector<8x1xf32>
    %636 = arith.addf %544, %635 : vector<8x1xf32>
    %637 = arith.mulf %292, %630 : vector<8x1xf32>
    %638 = arith.addf %546, %637 : vector<8x1xf32>
    %639 = arith.mulf %292, %632 : vector<8x1xf32>
    %640 = arith.addf %548, %639 : vector<8x1xf32>
    %641 = arith.mulf %292, %634 : vector<8x1xf32>
    %642 = arith.addf %550, %641 : vector<8x1xf32>
    %643 = arith.mulf %294, %628 : vector<8x1xf32>
    %644 = arith.addf %552, %643 : vector<8x1xf32>
    %645 = arith.mulf %294, %630 : vector<8x1xf32>
    %646 = arith.addf %554, %645 : vector<8x1xf32>
    %647 = arith.mulf %294, %632 : vector<8x1xf32>
    %648 = arith.addf %556, %647 : vector<8x1xf32>
    %649 = arith.mulf %294, %634 : vector<8x1xf32>
    %650 = arith.addf %558, %649 : vector<8x1xf32>
    %651 = arith.mulf %296, %628 : vector<8x1xf32>
    %652 = arith.addf %560, %651 : vector<8x1xf32>
    %653 = arith.mulf %296, %630 : vector<8x1xf32>
    %654 = arith.addf %562, %653 : vector<8x1xf32>
    %655 = arith.mulf %296, %632 : vector<8x1xf32>
    %656 = arith.addf %564, %655 : vector<8x1xf32>
    %657 = arith.mulf %296, %634 : vector<8x1xf32>
    %658 = arith.addf %566, %657 : vector<8x1xf32>
    %659 = arith.mulf %298, %628 : vector<8x1xf32>
    %660 = arith.addf %568, %659 : vector<8x1xf32>
    %661 = arith.mulf %298, %630 : vector<8x1xf32>
    %662 = arith.addf %570, %661 : vector<8x1xf32>
    %663 = arith.mulf %298, %632 : vector<8x1xf32>
    %664 = arith.addf %572, %663 : vector<8x1xf32>
    %665 = arith.mulf %298, %634 : vector<8x1xf32>
    %666 = arith.addf %574, %665 : vector<8x1xf32>
    %c2_122 = arith.constant 2 : index
    %667 = memref.load %arg1[%c2_122] : memref<3xf32, #tpu.memory_space<smem>>
    %c60 = arith.constant 60 : index
    %c0_123 = arith.constant 0 : index
    %c0_124 = arith.constant 0 : index
    %668 = vector.load %arg2[%c60, %c0_123, %c0_124] : memref<74x8x1xf32, #tpu.memory_space<vmem>>, vector<1x8x1xf32>
    %669 = vector.shape_cast %668 : vector<1x8x1xf32> to vector<8x1xf32>
    %c61 = arith.constant 61 : index
    %c0_125 = arith.constant 0 : index
    %c0_126 = arith.constant 0 : index
    %670 = vector.load %arg2[%c61, %c0_125, %c0_126] : memref<74x8x1xf32, #tpu.memory_space<vmem>>, vector<1x8x1xf32>
    %671 = vector.shape_cast %670 : vector<1x8x1xf32> to vector<8x1xf32>
    %c62 = arith.constant 62 : index
    %c0_127 = arith.constant 0 : index
    %c0_128 = arith.constant 0 : index
    %672 = vector.load %arg2[%c62, %c0_127, %c0_128] : memref<74x8x1xf32, #tpu.memory_space<vmem>>, vector<1x8x1xf32>
    %673 = vector.shape_cast %672 : vector<1x8x1xf32> to vector<8x1xf32>
    %c63 = arith.constant 63 : index
    %c0_129 = arith.constant 0 : index
    %c0_130 = arith.constant 0 : index
    %674 = vector.load %arg2[%c63, %c0_129, %c0_130] : memref<74x8x1xf32, #tpu.memory_space<vmem>>, vector<1x8x1xf32>
    %675 = vector.shape_cast %674 : vector<1x8x1xf32> to vector<8x1xf32>
    %c64 = arith.constant 64 : index
    %c0_131 = arith.constant 0 : index
    %c0_132 = arith.constant 0 : index
    %676 = vector.load %arg2[%c64, %c0_131, %c0_132] : memref<74x8x1xf32, #tpu.memory_space<vmem>>, vector<1x8x1xf32>
    %677 = vector.shape_cast %676 : vector<1x8x1xf32> to vector<8x1xf32>
    %c65 = arith.constant 65 : index
    %c0_133 = arith.constant 0 : index
    %c0_134 = arith.constant 0 : index
    %678 = vector.load %arg2[%c65, %c0_133, %c0_134] : memref<74x8x1xf32, #tpu.memory_space<vmem>>, vector<1x8x1xf32>
    %679 = vector.shape_cast %678 : vector<1x8x1xf32> to vector<8x1xf32>
    %c66 = arith.constant 66 : index
    %c0_135 = arith.constant 0 : index
    %c0_136 = arith.constant 0 : index
    %680 = vector.load %arg2[%c66, %c0_135, %c0_136] : memref<74x8x1xf32, #tpu.memory_space<vmem>>, vector<1x8x1xf32>
    %681 = vector.shape_cast %680 : vector<1x8x1xf32> to vector<8x1xf32>
    %c67 = arith.constant 67 : index
    %c0_137 = arith.constant 0 : index
    %c0_138 = arith.constant 0 : index
    %682 = vector.load %arg2[%c67, %c0_137, %c0_138] : memref<74x8x1xf32, #tpu.memory_space<vmem>>, vector<1x8x1xf32>
    %683 = vector.shape_cast %682 : vector<1x8x1xf32> to vector<8x1xf32>
    %c70 = arith.constant 70 : index
    %c0_139 = arith.constant 0 : index
    %c0_140 = arith.constant 0 : index
    %684 = vector.load %arg2[%c70, %c0_139, %c0_140] : memref<74x8x1xf32, #tpu.memory_space<vmem>>, vector<1x8x1xf32>
    %685 = vector.shape_cast %684 : vector<1x8x1xf32> to vector<8x1xf32>
    %686 = vector.broadcast %667 : f32 to vector<8x1xf32>
    %687 = arith.mulf %686, %685 : vector<8x1xf32>
    %688 = arith.mulf %687, %669 : vector<8x1xf32>
    %689 = arith.addf %580, %688 : vector<8x1xf32>
    %690 = arith.mulf %687, %671 : vector<8x1xf32>
    %691 = arith.addf %582, %690 : vector<8x1xf32>
    %692 = arith.mulf %687, %673 : vector<8x1xf32>
    %693 = arith.addf %584, %692 : vector<8x1xf32>
    %694 = arith.mulf %687, %675 : vector<8x1xf32>
    %695 = arith.addf %586, %694 : vector<8x1xf32>
    %c68 = arith.constant 68 : index
    %c0_141 = arith.constant 0 : index
    %c0_142 = arith.constant 0 : index
    %696 = vector.load %arg2[%c68, %c0_141, %c0_142] : memref<74x8x1xf32, #tpu.memory_space<vmem>>, vector<1x8x1xf32>
    %697 = vector.shape_cast %696 : vector<1x8x1xf32> to vector<8x1xf32>
    %698 = vector.broadcast %667 : f32 to vector<8x1xf32>
    %699 = arith.mulf %698, %697 : vector<8x1xf32>
    %700 = arith.mulf %699, %669 : vector<8x1xf32>
    %701 = arith.addf %0, %700 : vector<8x1xf32>
    %702 = arith.mulf %699, %671 : vector<8x1xf32>
    %703 = arith.addf %0, %702 : vector<8x1xf32>
    %704 = arith.mulf %699, %673 : vector<8x1xf32>
    %705 = arith.addf %0, %704 : vector<8x1xf32>
    %706 = arith.mulf %699, %675 : vector<8x1xf32>
    %707 = arith.addf %0, %706 : vector<8x1xf32>
    %c69 = arith.constant 69 : index
    %c0_143 = arith.constant 0 : index
    %c0_144 = arith.constant 0 : index
    %708 = vector.load %arg2[%c69, %c0_143, %c0_144] : memref<74x8x1xf32, #tpu.memory_space<vmem>>, vector<1x8x1xf32>
    %709 = vector.shape_cast %708 : vector<1x8x1xf32> to vector<8x1xf32>
    %710 = vector.broadcast %667 : f32 to vector<8x1xf32>
    %711 = arith.mulf %710, %709 : vector<8x1xf32>
    %712 = arith.mulf %711, %677 : vector<8x1xf32>
    %713 = arith.addf %701, %712 : vector<8x1xf32>
    %714 = arith.mulf %711, %679 : vector<8x1xf32>
    %715 = arith.addf %703, %714 : vector<8x1xf32>
    %716 = arith.mulf %711, %681 : vector<8x1xf32>
    %717 = arith.addf %705, %716 : vector<8x1xf32>
    %718 = arith.mulf %711, %683 : vector<8x1xf32>
    %719 = arith.addf %707, %718 : vector<8x1xf32>
    %720 = arith.mulf %669, %713 : vector<8x1xf32>
    %721 = arith.addf %636, %720 : vector<8x1xf32>
    %722 = arith.mulf %669, %715 : vector<8x1xf32>
    %723 = arith.addf %638, %722 : vector<8x1xf32>
    %724 = arith.mulf %669, %717 : vector<8x1xf32>
    %725 = arith.addf %640, %724 : vector<8x1xf32>
    %726 = arith.mulf %669, %719 : vector<8x1xf32>
    %727 = arith.addf %642, %726 : vector<8x1xf32>
    %728 = arith.mulf %671, %713 : vector<8x1xf32>
    %729 = arith.addf %644, %728 : vector<8x1xf32>
    %730 = arith.mulf %671, %715 : vector<8x1xf32>
    %731 = arith.addf %646, %730 : vector<8x1xf32>
    %732 = arith.mulf %671, %717 : vector<8x1xf32>
    %733 = arith.addf %648, %732 : vector<8x1xf32>
    %734 = arith.mulf %671, %719 : vector<8x1xf32>
    %735 = arith.addf %650, %734 : vector<8x1xf32>
    %736 = arith.mulf %673, %713 : vector<8x1xf32>
    %737 = arith.addf %652, %736 : vector<8x1xf32>
    %738 = arith.mulf %673, %715 : vector<8x1xf32>
    %739 = arith.addf %654, %738 : vector<8x1xf32>
    %740 = arith.mulf %673, %717 : vector<8x1xf32>
    %741 = arith.addf %656, %740 : vector<8x1xf32>
    %742 = arith.mulf %673, %719 : vector<8x1xf32>
    %743 = arith.addf %658, %742 : vector<8x1xf32>
    %744 = arith.mulf %675, %713 : vector<8x1xf32>
    %745 = arith.addf %660, %744 : vector<8x1xf32>
    %746 = arith.mulf %675, %715 : vector<8x1xf32>
    %747 = arith.addf %662, %746 : vector<8x1xf32>
    %748 = arith.mulf %675, %717 : vector<8x1xf32>
    %749 = arith.addf %664, %748 : vector<8x1xf32>
    %750 = arith.mulf %675, %719 : vector<8x1xf32>
    %751 = arith.addf %666, %750 : vector<8x1xf32>
    %c73 = arith.constant 73 : index
    %c0_145 = arith.constant 0 : index
    %c0_146 = arith.constant 0 : index
    %752 = vector.load %arg2[%c73, %c0_145, %c0_146] : memref<74x8x1xf32, #tpu.memory_space<vmem>>, vector<1x8x1xf32>
    %753 = vector.shape_cast %752 : vector<1x8x1xf32> to vector<8x1xf32>
    %754 = vector.broadcast %667 : f32 to vector<8x1xf32>
    %755 = arith.mulf %754, %753 : vector<8x1xf32>
    %756 = arith.mulf %755, %677 : vector<8x1xf32>
    %757 = arith.addf %689, %756 : vector<8x1xf32>
    %758 = arith.mulf %755, %679 : vector<8x1xf32>
    %759 = arith.addf %691, %758 : vector<8x1xf32>
    %760 = arith.mulf %755, %681 : vector<8x1xf32>
    %761 = arith.addf %693, %760 : vector<8x1xf32>
    %762 = arith.mulf %755, %683 : vector<8x1xf32>
    %763 = arith.addf %695, %762 : vector<8x1xf32>
    %c71 = arith.constant 71 : index
    %c0_147 = arith.constant 0 : index
    %c0_148 = arith.constant 0 : index
    %764 = vector.load %arg2[%c71, %c0_147, %c0_148] : memref<74x8x1xf32, #tpu.memory_space<vmem>>, vector<1x8x1xf32>
    %765 = vector.shape_cast %764 : vector<1x8x1xf32> to vector<8x1xf32>
    %766 = vector.broadcast %667 : f32 to vector<8x1xf32>
    %767 = arith.mulf %766, %765 : vector<8x1xf32>
    %768 = arith.mulf %767, %669 : vector<8x1xf32>
    %769 = arith.addf %0, %768 : vector<8x1xf32>
    %770 = arith.mulf %767, %671 : vector<8x1xf32>
    %771 = arith.addf %0, %770 : vector<8x1xf32>
    %772 = arith.mulf %767, %673 : vector<8x1xf32>
    %773 = arith.addf %0, %772 : vector<8x1xf32>
    %774 = arith.mulf %767, %675 : vector<8x1xf32>
    %775 = arith.addf %0, %774 : vector<8x1xf32>
    %c72 = arith.constant 72 : index
    %c0_149 = arith.constant 0 : index
    %c0_150 = arith.constant 0 : index
    %776 = vector.load %arg2[%c72, %c0_149, %c0_150] : memref<74x8x1xf32, #tpu.memory_space<vmem>>, vector<1x8x1xf32>
    %777 = vector.shape_cast %776 : vector<1x8x1xf32> to vector<8x1xf32>
    %778 = vector.broadcast %667 : f32 to vector<8x1xf32>
    %779 = arith.mulf %778, %777 : vector<8x1xf32>
    %780 = arith.mulf %779, %677 : vector<8x1xf32>
    %781 = arith.addf %769, %780 : vector<8x1xf32>
    %782 = arith.mulf %779, %679 : vector<8x1xf32>
    %783 = arith.addf %771, %782 : vector<8x1xf32>
    %784 = arith.mulf %779, %681 : vector<8x1xf32>
    %785 = arith.addf %773, %784 : vector<8x1xf32>
    %786 = arith.mulf %779, %683 : vector<8x1xf32>
    %787 = arith.addf %775, %786 : vector<8x1xf32>
    %788 = arith.mulf %677, %781 : vector<8x1xf32>
    %789 = arith.addf %721, %788 : vector<8x1xf32>
    %790 = arith.mulf %677, %783 : vector<8x1xf32>
    %791 = arith.addf %723, %790 : vector<8x1xf32>
    %792 = arith.mulf %677, %785 : vector<8x1xf32>
    %793 = arith.addf %725, %792 : vector<8x1xf32>
    %794 = arith.mulf %677, %787 : vector<8x1xf32>
    %795 = arith.addf %727, %794 : vector<8x1xf32>
    %796 = arith.mulf %679, %781 : vector<8x1xf32>
    %797 = arith.addf %729, %796 : vector<8x1xf32>
    %798 = arith.mulf %679, %783 : vector<8x1xf32>
    %799 = arith.addf %731, %798 : vector<8x1xf32>
    %800 = arith.mulf %679, %785 : vector<8x1xf32>
    %801 = arith.addf %733, %800 : vector<8x1xf32>
    %802 = arith.mulf %679, %787 : vector<8x1xf32>
    %803 = arith.addf %735, %802 : vector<8x1xf32>
    %804 = arith.mulf %681, %781 : vector<8x1xf32>
    %805 = arith.addf %737, %804 : vector<8x1xf32>
    %806 = arith.mulf %681, %783 : vector<8x1xf32>
    %807 = arith.addf %739, %806 : vector<8x1xf32>
    %808 = arith.mulf %681, %785 : vector<8x1xf32>
    %809 = arith.addf %741, %808 : vector<8x1xf32>
    %810 = arith.mulf %681, %787 : vector<8x1xf32>
    %811 = arith.addf %743, %810 : vector<8x1xf32>
    %812 = arith.mulf %683, %781 : vector<8x1xf32>
    %813 = arith.addf %745, %812 : vector<8x1xf32>
    %814 = arith.mulf %683, %783 : vector<8x1xf32>
    %815 = arith.addf %747, %814 : vector<8x1xf32>
    %816 = arith.mulf %683, %785 : vector<8x1xf32>
    %817 = arith.addf %749, %816 : vector<8x1xf32>
    %818 = arith.mulf %683, %787 : vector<8x1xf32>
    %819 = arith.addf %751, %818 : vector<8x1xf32>
    %c0_151 = arith.constant 0 : index
    %c0_152 = arith.constant 0 : index
    %c0_153 = arith.constant 0 : index
    %820 = vector.load %arg3[%c0_151, %c0_152, %c0_153] : memref<4x8x1xf32, #tpu.memory_space<vmem>>, vector<1x8x1xf32>
    %821 = vector.shape_cast %820 : vector<1x8x1xf32> to vector<8x1xf32>
    %822 = vector.shape_cast %757 : vector<8x1xf32> to vector<1x8x1xf32>
    tpu.vector_store %arg3[%c0_151, %c0_152, %c0_153], %822 {strides = array<i32>} : memref<4x8x1xf32, #tpu.memory_space<vmem>>, vector<1x8x1xf32>,
    %c0_154 = arith.constant 0 : index
    %c0_155 = arith.constant 0 : index
    %c0_156 = arith.constant 0 : index
    %c0_157 = arith.constant 0 : index
    %823 = vector.load %arg4[%c0_154, %c0_155, %c0_156, %c0_157] : memref<4x4x8x1xf32, #tpu.memory_space<vmem>>, vector<1x1x8x1xf32>
    %824 = vector.shape_cast %823 : vector<1x1x8x1xf32> to vector<8x1xf32>
    %825 = vector.shape_cast %789 : vector<8x1xf32> to vector<1x1x8x1xf32>
    tpu.vector_store %arg4[%c0_154, %c0_155, %c0_156, %c0_157], %825 {strides = array<i32>} : memref<4x4x8x1xf32, #tpu.memory_space<vmem>>, vector<1x1x8x1xf32>,
    %c0_158 = arith.constant 0 : index
    %c1_159 = arith.constant 1 : index
    %c0_160 = arith.constant 0 : index
    %c0_161 = arith.constant 0 : index
    %826 = vector.load %arg4[%c0_158, %c1_159, %c0_160, %c0_161] : memref<4x4x8x1xf32, #tpu.memory_space<vmem>>, vector<1x1x8x1xf32>
    %827 = vector.shape_cast %826 : vector<1x1x8x1xf32> to vector<8x1xf32>
    %828 = vector.shape_cast %791 : vector<8x1xf32> to vector<1x1x8x1xf32>
    tpu.vector_store %arg4[%c0_158, %c1_159, %c0_160, %c0_161], %828 {strides = array<i32>} : memref<4x4x8x1xf32, #tpu.memory_space<vmem>>, vector<1x1x8x1xf32>,
    %c0_162 = arith.constant 0 : index
    %c2_163 = arith.constant 2 : index
    %c0_164 = arith.constant 0 : index
    %c0_165 = arith.constant 0 : index
    %829 = vector.load %arg4[%c0_162, %c2_163, %c0_164, %c0_165] : memref<4x4x8x1xf32, #tpu.memory_space<vmem>>, vector<1x1x8x1xf32>
    %830 = vector.shape_cast %829 : vector<1x1x8x1xf32> to vector<8x1xf32>
    %831 = vector.shape_cast %793 : vector<8x1xf32> to vector<1x1x8x1xf32>
    tpu.vector_store %arg4[%c0_162, %c2_163, %c0_164, %c0_165], %831 {strides = array<i32>} : memref<4x4x8x1xf32, #tpu.memory_space<vmem>>, vector<1x1x8x1xf32>,
    %c0_166 = arith.constant 0 : index
    %c3_167 = arith.constant 3 : index
    %c0_168 = arith.constant 0 : index
    %c0_169 = arith.constant 0 : index
    %832 = vector.load %arg4[%c0_166, %c3_167, %c0_168, %c0_169] : memref<4x4x8x1xf32, #tpu.memory_space<vmem>>, vector<1x1x8x1xf32>
    %833 = vector.shape_cast %832 : vector<1x1x8x1xf32> to vector<8x1xf32>
    %834 = vector.shape_cast %795 : vector<8x1xf32> to vector<1x1x8x1xf32>
    tpu.vector_store %arg4[%c0_166, %c3_167, %c0_168, %c0_169], %834 {strides = array<i32>} : memref<4x4x8x1xf32, #tpu.memory_space<vmem>>, vector<1x1x8x1xf32>,
    %c1_170 = arith.constant 1 : index
    %c0_171 = arith.constant 0 : index
    %c0_172 = arith.constant 0 : index
    %835 = vector.load %arg3[%c1_170, %c0_171, %c0_172] : memref<4x8x1xf32, #tpu.memory_space<vmem>>, vector<1x8x1xf32>
    %836 = vector.shape_cast %835 : vector<1x8x1xf32> to vector<8x1xf32>
    %837 = vector.shape_cast %759 : vector<8x1xf32> to vector<1x8x1xf32>
    tpu.vector_store %arg3[%c1_170, %c0_171, %c0_172], %837 {strides = array<i32>} : memref<4x8x1xf32, #tpu.memory_space<vmem>>, vector<1x8x1xf32>,
    %c1_173 = arith.constant 1 : index
    %c0_174 = arith.constant 0 : index
    %c0_175 = arith.constant 0 : index
    %c0_176 = arith.constant 0 : index
    %838 = vector.load %arg4[%c1_173, %c0_174, %c0_175, %c0_176] : memref<4x4x8x1xf32, #tpu.memory_space<vmem>>, vector<1x1x8x1xf32>
    %839 = vector.shape_cast %838 : vector<1x1x8x1xf32> to vector<8x1xf32>
    %840 = vector.shape_cast %797 : vector<8x1xf32> to vector<1x1x8x1xf32>
    tpu.vector_store %arg4[%c1_173, %c0_174, %c0_175, %c0_176], %840 {strides = array<i32>} : memref<4x4x8x1xf32, #tpu.memory_space<vmem>>, vector<1x1x8x1xf32>,
    %c1_177 = arith.constant 1 : index
    %c1_178 = arith.constant 1 : index
    %c0_179 = arith.constant 0 : index
    %c0_180 = arith.constant 0 : index
    %841 = vector.load %arg4[%c1_177, %c1_178, %c0_179, %c0_180] : memref<4x4x8x1xf32, #tpu.memory_space<vmem>>, vector<1x1x8x1xf32>
    %842 = vector.shape_cast %841 : vector<1x1x8x1xf32> to vector<8x1xf32>
    %843 = vector.shape_cast %799 : vector<8x1xf32> to vector<1x1x8x1xf32>
    tpu.vector_store %arg4[%c1_177, %c1_178, %c0_179, %c0_180], %843 {strides = array<i32>} : memref<4x4x8x1xf32, #tpu.memory_space<vmem>>, vector<1x1x8x1xf32>,
    %c1_181 = arith.constant 1 : index
    %c2_182 = arith.constant 2 : index
    %c0_183 = arith.constant 0 : index
    %c0_184 = arith.constant 0 : index
    %844 = vector.load %arg4[%c1_181, %c2_182, %c0_183, %c0_184] : memref<4x4x8x1xf32, #tpu.memory_space<vmem>>, vector<1x1x8x1xf32>
    %845 = vector.shape_cast %844 : vector<1x1x8x1xf32> to vector<8x1xf32>
    %846 = vector.shape_cast %801 : vector<8x1xf32> to vector<1x1x8x1xf32>
    tpu.vector_store %arg4[%c1_181, %c2_182, %c0_183, %c0_184], %846 {strides = array<i32>} : memref<4x4x8x1xf32, #tpu.memory_space<vmem>>, vector<1x1x8x1xf32>,
    %c1_185 = arith.constant 1 : index
    %c3_186 = arith.constant 3 : index
    %c0_187 = arith.constant 0 : index
    %c0_188 = arith.constant 0 : index
    %847 = vector.load %arg4[%c1_185, %c3_186, %c0_187, %c0_188] : memref<4x4x8x1xf32, #tpu.memory_space<vmem>>, vector<1x1x8x1xf32>
    %848 = vector.shape_cast %847 : vector<1x1x8x1xf32> to vector<8x1xf32>
    %849 = vector.shape_cast %803 : vector<8x1xf32> to vector<1x1x8x1xf32>
    tpu.vector_store %arg4[%c1_185, %c3_186, %c0_187, %c0_188], %849 {strides = array<i32>} : memref<4x4x8x1xf32, #tpu.memory_space<vmem>>, vector<1x1x8x1xf32>,
    %c2_189 = arith.constant 2 : index
    %c0_190 = arith.constant 0 : index
    %c0_191 = arith.constant 0 : index
    %850 = vector.load %arg3[%c2_189, %c0_190, %c0_191] : memref<4x8x1xf32, #tpu.memory_space<vmem>>, vector<1x8x1xf32>
    %851 = vector.shape_cast %850 : vector<1x8x1xf32> to vector<8x1xf32>
    %852 = vector.shape_cast %761 : vector<8x1xf32> to vector<1x8x1xf32>
    tpu.vector_store %arg3[%c2_189, %c0_190, %c0_191], %852 {strides = array<i32>} : memref<4x8x1xf32, #tpu.memory_space<vmem>>, vector<1x8x1xf32>,
    %c2_192 = arith.constant 2 : index
    %c0_193 = arith.constant 0 : index
    %c0_194 = arith.constant 0 : index
    %c0_195 = arith.constant 0 : index
    %853 = vector.load %arg4[%c2_192, %c0_193, %c0_194, %c0_195] : memref<4x4x8x1xf32, #tpu.memory_space<vmem>>, vector<1x1x8x1xf32>
    %854 = vector.shape_cast %853 : vector<1x1x8x1xf32> to vector<8x1xf32>
    %855 = vector.shape_cast %805 : vector<8x1xf32> to vector<1x1x8x1xf32>
    tpu.vector_store %arg4[%c2_192, %c0_193, %c0_194, %c0_195], %855 {strides = array<i32>} : memref<4x4x8x1xf32, #tpu.memory_space<vmem>>, vector<1x1x8x1xf32>,
    %c2_196 = arith.constant 2 : index
    %c1_197 = arith.constant 1 : index
    %c0_198 = arith.constant 0 : index
    %c0_199 = arith.constant 0 : index
    %856 = vector.load %arg4[%c2_196, %c1_197, %c0_198, %c0_199] : memref<4x4x8x1xf32, #tpu.memory_space<vmem>>, vector<1x1x8x1xf32>
    %857 = vector.shape_cast %856 : vector<1x1x8x1xf32> to vector<8x1xf32>
    %858 = vector.shape_cast %807 : vector<8x1xf32> to vector<1x1x8x1xf32>
    tpu.vector_store %arg4[%c2_196, %c1_197, %c0_198, %c0_199], %858 {strides = array<i32>} : memref<4x4x8x1xf32, #tpu.memory_space<vmem>>, vector<1x1x8x1xf32>,
    %c2_200 = arith.constant 2 : index
    %c2_201 = arith.constant 2 : index
    %c0_202 = arith.constant 0 : index
    %c0_203 = arith.constant 0 : index
    %859 = vector.load %arg4[%c2_200, %c2_201, %c0_202, %c0_203] : memref<4x4x8x1xf32, #tpu.memory_space<vmem>>, vector<1x1x8x1xf32>
    %860 = vector.shape_cast %859 : vector<1x1x8x1xf32> to vector<8x1xf32>
    %861 = vector.shape_cast %809 : vector<8x1xf32> to vector<1x1x8x1xf32>
    tpu.vector_store %arg4[%c2_200, %c2_201, %c0_202, %c0_203], %861 {strides = array<i32>} : memref<4x4x8x1xf32, #tpu.memory_space<vmem>>, vector<1x1x8x1xf32>,
    %c2_204 = arith.constant 2 : index
    %c3_205 = arith.constant 3 : index
    %c0_206 = arith.constant 0 : index
    %c0_207 = arith.constant 0 : index
    %862 = vector.load %arg4[%c2_204, %c3_205, %c0_206, %c0_207] : memref<4x4x8x1xf32, #tpu.memory_space<vmem>>, vector<1x1x8x1xf32>
    %863 = vector.shape_cast %862 : vector<1x1x8x1xf32> to vector<8x1xf32>
    %864 = vector.shape_cast %811 : vector<8x1xf32> to vector<1x1x8x1xf32>
    tpu.vector_store %arg4[%c2_204, %c3_205, %c0_206, %c0_207], %864 {strides = array<i32>} : memref<4x4x8x1xf32, #tpu.memory_space<vmem>>, vector<1x1x8x1xf32>,
    %c3_208 = arith.constant 3 : index
    %c0_209 = arith.constant 0 : index
    %c0_210 = arith.constant 0 : index
    %865 = vector.load %arg3[%c3_208, %c0_209, %c0_210] : memref<4x8x1xf32, #tpu.memory_space<vmem>>, vector<1x8x1xf32>
    %866 = vector.shape_cast %865 : vector<1x8x1xf32> to vector<8x1xf32>
    %867 = vector.shape_cast %763 : vector<8x1xf32> to vector<1x8x1xf32>
    tpu.vector_store %arg3[%c3_208, %c0_209, %c0_210], %867 {strides = array<i32>} : memref<4x8x1xf32, #tpu.memory_space<vmem>>, vector<1x8x1xf32>,
    %c3_211 = arith.constant 3 : index
    %c0_212 = arith.constant 0 : index
    %c0_213 = arith.constant 0 : index
    %c0_214 = arith.constant 0 : index
    %868 = vector.load %arg4[%c3_211, %c0_212, %c0_213, %c0_214] : memref<4x4x8x1xf32, #tpu.memory_space<vmem>>, vector<1x1x8x1xf32>
    %869 = vector.shape_cast %868 : vector<1x1x8x1xf32> to vector<8x1xf32>
    %870 = vector.shape_cast %813 : vector<8x1xf32> to vector<1x1x8x1xf32>
    tpu.vector_store %arg4[%c3_211, %c0_212, %c0_213, %c0_214], %870 {strides = array<i32>} : memref<4x4x8x1xf32, #tpu.memory_space<vmem>>, vector<1x1x8x1xf32>,
    %c3_215 = arith.constant 3 : index
    %c1_216 = arith.constant 1 : index
    %c0_217 = arith.constant 0 : index
    %c0_218 = arith.constant 0 : index
    %871 = vector.load %arg4[%c3_215, %c1_216, %c0_217, %c0_218] : memref<4x4x8x1xf32, #tpu.memory_space<vmem>>, vector<1x1x8x1xf32>
    %872 = vector.shape_cast %871 : vector<1x1x8x1xf32> to vector<8x1xf32>
    %873 = vector.shape_cast %815 : vector<8x1xf32> to vector<1x1x8x1xf32>
    tpu.vector_store %arg4[%c3_215, %c1_216, %c0_217, %c0_218], %873 {strides = array<i32>} : memref<4x4x8x1xf32, #tpu.memory_space<vmem>>, vector<1x1x8x1xf32>,
    %c3_219 = arith.constant 3 : index
    %c2_220 = arith.constant 2 : index
    %c0_221 = arith.constant 0 : index
    %c0_222 = arith.constant 0 : index
    %874 = vector.load %arg4[%c3_219, %c2_220, %c0_221, %c0_222] : memref<4x4x8x1xf32, #tpu.memory_space<vmem>>, vector<1x1x8x1xf32>
    %875 = vector.shape_cast %874 : vector<1x1x8x1xf32> to vector<8x1xf32>
    %876 = vector.shape_cast %817 : vector<8x1xf32> to vector<1x1x8x1xf32>
    tpu.vector_store %arg4[%c3_219, %c2_220, %c0_221, %c0_222], %876 {strides = array<i32>} : memref<4x4x8x1xf32, #tpu.memory_space<vmem>>, vector<1x1x8x1xf32>,
    %c3_223 = arith.constant 3 : index
    %c3_224 = arith.constant 3 : index
    %c0_225 = arith.constant 0 : index
    %c0_226 = arith.constant 0 : index
    %877 = vector.load %arg4[%c3_223, %c3_224, %c0_225, %c0_226] : memref<4x4x8x1xf32, #tpu.memory_space<vmem>>, vector<1x1x8x1xf32>
    %878 = vector.shape_cast %877 : vector<1x1x8x1xf32> to vector<8x1xf32>
    %879 = vector.shape_cast %819 : vector<8x1xf32> to vector<1x1x8x1xf32>
    tpu.vector_store %arg4[%c3_223, %c3_224, %c0_225, %c0_226], %879 {strides = array<i32>} : memref<4x4x8x1xf32, #tpu.memory_space<vmem>>, vector<1x1x8x1xf32>,
    return
  }
  func.func @transform_0(%arg0: i32, %arg1: memref<3xf32, #tpu.memory_space<smem>>) -> (i32, i32, i32) {
    %c0_i32 = arith.constant 0 : i32
    %c0_i32_0 = arith.constant 0 : i32
    %c0_i32_1 = arith.constant 0 : i32
    return %c0_i32, %c0_i32_0, %arg0 : i32, i32, i32
  }
  func.func @transform_1(%arg0: i32, %arg1: memref<3xf32, #tpu.memory_space<smem>>) -> (i32, i32, i32) {
    %c0_i32 = arith.constant 0 : i32
    %c0_i32_0 = arith.constant 0 : i32
    %c0_i32_1 = arith.constant 0 : i32
    return %c0_i32, %c0_i32_0, %arg0 : i32, i32, i32
  }
  func.func @transform_2(%arg0: i32, %arg1: memref<3xf32, #tpu.memory_space<smem>>) -> (i32, i32, i32, i32) {
    %c0_i32 = arith.constant 0 : i32
    %c0_i32_0 = arith.constant 0 : i32
    %c0_i32_1 = arith.constant 0 : i32
    %c0_i32_2 = arith.constant 0 : i32
    return %c0_i32, %c0_i32_0, %c0_i32_1, %arg0 : i32, i32, i32, i32
  }
}

</mosaic_0001>

<bundles_post_ra>
// kernel: tpu_custom_call.1
= control target key start
LH: loop header
LB: loop body
LE: loop exit
PB: predicated region body
PF: predicated region fallthrough
CT: control target
= control target key end

     0   :  { %s957_s15 = smov [#allocation3]   ;;  %s2128_s0 = inlined_call_operand.vmem [shape: f32[3], index: 0, kind: input, shape index: {}]   ;;  %s2129_s1 = inlined_call_operand.vmem [shape: f32[74,8,1], index: 1, kind: input, shape index: {}]   ;;  %s2130_s2 = inlined_call_operand.vmem [shape: f32[4,8,1], index: 2, kind: output, shape index: {0}]   ;;  %s2131_s3 = inlined_call_operand.vmem [shape: f32[4,4,8,1], index: 3, kind: output, shape index: {1}]  }
   0x1   :  { %s10_s14 = sshll.u32 %s2128_s0, 4  ;;  %s11_s14 = int_to_ptr.vmem [resolvable:$true] %s10_s14 }
   0x2   :  { %13 = dma.vmem_to_smem %s11_s14, 16, %s957_s15, [#allocation2] }
   0x3   :  { %955 = dma.done.wait [#allocation2], 16 }
   0x4   :  { %956 = vsyncadd [#allocation2], 4294967280 }
   0x5   :  { %16 = sfence }
   0x6   :  { %s19_s16 = sld [smem:[#allocation3]]  ;;  %v860_v0 = vld [vmem:[%s2129_s1 + $0x78] sm:$0xff]  ;;  %v889_v3 = vld [vmem:[%s2129_s1 + $0x160] sm:$0xff]  ;;  %v894_v4 = vld [vmem:[%s2129_s1 + $0x188] sm:$0xff]  ;;  %vm802_vm0 = vcmask 7168  }
   0x7   :  { %s872_s17 = sld [smem:[#allocation3 + $0x1]]  ;;  %v864_v1 = vld [vmem:[%s2129_s1 + $0x98] sm:$0xff]  ;;  %v899_v5 = vld [vmem:[%s2129_s1 + $0x1b0] sm:$0xff]  ;;  %v1007_v7 = vld [vmem:[%s2129_s1] sm:$0xff] }
   0x8   :  { %s981_s18 = sld [smem:[#allocation3 + $0x2]]  ;;  %v868_v2 = vld [vmem:[%s2129_s1 + $0xb8] sm:$0xff]  ;;  %v1012_v8 = vld [vmem:[%s2129_s1 + $0x20] sm:$0xff]  ;;  %v918_v19 = vld [vmem:[%s2129_s1 + $0x230] sm:$0xff] }
   0x9   :  { %v904_v6 = vld [vmem:[%s2129_s1 + $0x1d8] sm:$0xff]  ;;  %v1017_v9 = vld [vmem:[%s2129_s1 + $0x40] sm:$0xff]  ;;  %v921_v24 = vld [vmem:[%s2129_s1 + $0x248] sm:$0xff] }
   0xa   :  { %v1028_v14 = vld [vmem:[%s2129_s1 + $0xc0] sm:$0xff]  ;;  %v862_v26 = vld [vmem:[%s2129_s1 + $0x68] sm:$0xff]  ;;  %v863_v31 = vld [vmem:[%s2129_s1 + $0x70] sm:$0xff] }
   0xb   :  { %v1033_v15 = vld [vmem:[%s2129_s1 + $0xe0] sm:$0xff]  ;;  %v866_v33 = vld [vmem:[%s2129_s1 + $0x88] sm:$0xff]  ;;  %v867_v48 = vld [vmem:[%s2129_s1 + $0x90] sm:$0xff] }
   0xc   :  { %v45_v10 = vstv %s19_s16  ;;  %v1038_v16 = vld [vmem:[%s2129_s1 + $0x100] sm:$0xff]  ;;  %v870_v50 = vld [vmem:[%s2129_s1 + $0xa8] sm:$0xff]  ;;  %v871_v55 = vld [vmem:[%s2129_s1 + $0xb0] sm:$0xff] }
   0xd   :  { %v1019_v11 = vmul.f32 %v860_v0, %v45_v10  ;;  %v1021_v12 = vmul.f32 %v864_v1, %v45_v10  ;;  %v1023_v13 = vmul.f32 %v868_v2, %v45_v10  ;;  %v1043_v17 = vld [vmem:[%s2129_s1 + $0x120] sm:$0xff]  ;;  %v1045_v18 = vstv %s872_s17  ;;  %v891_v1 = vld [vmem:[%s2129_s1 + $0x148] sm:$0xff] }
   0xe   :  { %v1051_v20 = vmul.f32 %v889_v3, %v1045_v18  ;;  %v1054_v21 = vmul.f32 %v894_v4, %v1045_v18  ;;  %v1057_v22 = vmul.f32 %v899_v5, %v1045_v18  ;;  %v1060_v23 = vmul.f32 %v904_v6, %v1045_v18  ;;  %v861_v25 = vld [vmem:[%s2129_s1 + $0x60] sm:$0xff]  ;;  %v892_v6 = vld [vmem:[%s2129_s1 + $0x150] sm:$0xff] }
   0xf   :  { %2260 = vst [vmem:[#allocation5_spill] sm:$0xff] %v1019_v11  ;;  %v47_v27 = vmul.f32 %v1019_v11, %v1007_v7  ;;  %v123_v28 = vmul.f32 %v1012_v8, %v1021_v12  ;;  %v199_v29 = vmul.f32 %v1017_v9, %v1023_v13  ;;  %v1078_v30 = vstv %s981_s18  ;;  %v865_v32 = vld [vmem:[%s2129_s1 + $0x80] sm:$0xff] }
  0x10   :  { %2261 = vst [vmem:[#allocation6_spill] sm:$0xff] %v1021_v12  ;;  %v309_v34 = vmul.f32 %v1028_v14, %v1051_v20  ;;  %v396_v35 = vmul.f32 %v1033_v15, %v1054_v21  ;;  %v483_v36 = vmul.f32 %v1038_v16, %v1057_v22  ;;  %v570_v37 = vmul.f32 %v1043_v17, %v1060_v23  ;;  %v1100_v39 = vld [vmem:[%s2129_s1 + $0x1e0] sm:$0xff] }
  0x11   :  { %2262 = vst [vmem:[#allocation7_spill] sm:$0xff] %v1023_v13  ;;  %v124_v38 = vadd.f32 %v123_v28, %v47_v27  ;;  %v1105_v40 = vld [vmem:[%s2129_s1 + $0x200] sm:$0xff]  ;;  %v1108_v41 = vmul.f32 %v918_v19, %v1078_v30  ;;  %v1111_v42 = vmul.f32 %v921_v24, %v1078_v30  ;;  %v1113_v43 = vmul.f32 %v861_v25, %v45_v10  ;;  %v895_v27 = vld [vmem:[%s2129_s1 + $0x168] sm:$0xff] }
  0x12   :  { %2263 = vst [vmem:[#allocation8_spill] sm:$0xff] %v1051_v20  ;;  %v1115_v44 = vmul.f32 %v862_v26, %v45_v10  ;;  %v1117_v45 = vmul.f32 %v863_v31, %v45_v10  ;;  %v1119_v46 = vmul.f32 %v865_v32, %v45_v10  ;;  %v1121_v47 = vmul.f32 %v866_v33, %v45_v10  ;;  %v869_v49 = vld [vmem:[%s2129_s1 + $0xa0] sm:$0xff] }
  0x13   :  { %2264 = vst [vmem:[#allocation9_spill] sm:$0xff] %v1054_v21  ;;  %v200_v51 = vadd.f32 %v199_v29, %v124_v38  ;;  %v675_v52 = vmul.f32 %v1100_v39, %v1108_v41  ;;  %v740_v53 = vmul.f32 %v1105_v40, %v1111_v42  ;;  %v58_v54 = vmul.f32 %v1113_v43, %v1007_v7  ;;  %v890_v56 = vld [vmem:[%s2129_s1 + $0x140] sm:$0xff] }
  0x14   :  { %2265 = vst [vmem:[#allocation10_spill] sm:$0xff] %v1057_v22  ;;  %v69_v57 = vmul.f32 %v1012_v8, %v1115_v44  ;;  %v80_v58 = vmul.f32 %v1017_v9, %v1117_v45  ;;  %v134_v59 = vmul.f32 %v1119_v46, %v1007_v7  ;;  %v145_v60 = vmul.f32 %v1012_v8, %v1121_v47 }
  0x15   :  { %2266 = vst [vmem:[#allocation11_spill] sm:$0xff] %v1060_v23  ;;  %v310_v61 = vadd.f32 %v309_v34, %v200_v51  ;;  %v1152_v62 = vmul.f32 %v867_v48, %v45_v10  ;;  %v1154_v63 = vmul.f32 %v869_v49, %v45_v10  ;;  %v1156_v0 = vmul.f32 %v870_v50, %v45_v10  ;;  %v896_v48 = vld [vmem:[%s2129_s1 + $0x170] sm:$0xff] }
  0x16   :  { %2267 = vst [vmem:[#allocation12_spill] sm:$0xff] %v1108_v41  ;;  %v70_v2 = vadd.f32 %v69_v57, %v58_v54  ;;  %v146_v3 = vadd.f32 %v145_v60, %v134_v59  ;;  %v1161_v4 = vmul.f32 %v871_v55, %v45_v10  ;;  %v1164_v5 = vmul.f32 %v890_v56, %v1045_v18  ;;  %v893_v10 = vld [vmem:[%s2129_s1 + $0x158] sm:$0xff]  ;;  %v898_v59 = vld [vmem:[%s2129_s1 + $0x180] sm:$0xff]  ;;  %v900_v60 = vld [vmem:[%s2129_s1 + $0x190] sm:$0xff] }
  0x17   :  { %2268 = vst [vmem:[#allocation13_spill] sm:$0xff] %v1111_v42  ;;  %v397_v19 = vadd.f32 %v396_v35, %v310_v61  ;;  %v156_v24 = vmul.f32 %v1017_v9, %v1152_v62  ;;  %v210_v25 = vmul.f32 %v1154_v63, %v1007_v7  ;;  %v221_v26 = vmul.f32 %v1012_v8, %v1156_v0  ;;  %v897_v54 = vld [vmem:[%s2129_s1 + $0x178] sm:$0xff] }
  0x18   :  { %v1181_v28 = vadd.f32 %v80_v58, %v70_v2  ;;  %v232_v29 = vmul.f32 %v1017_v9, %v1161_v4  ;;  %v320_v31 = vmul.f32 %v1028_v14, %v1164_v5  ;;  %v1188_v32 = vmul.f32 %v891_v1, %v1045_v18 }
  0x19   :  { %v484_v33 = vadd.f32 %v483_v36, %v397_v19  ;;  %v1190_v34 = vadd.f32 %v156_v24, %v146_v3  ;;  %v222_v35 = vadd.f32 %v221_v26, %v210_v25  ;;  %v1193_v38 = vmul.f32 %v892_v6, %v1045_v18  ;;  %v901_v3 = vld [vmem:[%s2129_s1 + $0x198] sm:$0xff] }
  0x1a   :  { %2269 = vst [vmem:[#allocation14_spill] sm:$0xff] %v1181_v28  ;;  %v88_v49 = vmul.f32 %v1181_v28, %v1007_v7  ;;  %v331_v50 = vmul.f32 %v1033_v15, %v1188_v32  ;;  %v1203_v51 = vmul.f32 %v893_v10, %v1045_v18  ;;  %v1206_v36 = vmul.f32 %v895_v27, %v1045_v18 }
  0x1b   :  { %2270 = vst [vmem:[#allocation15_spill] sm:$0xff] %v1190_v34  ;;  %v571_v55 = vadd.f32 %v570_v37, %v484_v33  ;;  %v164_v56 = vmul.f32 %v1012_v8, %v1190_v34  ;;  %v1213_v57 = vadd.f32 %v232_v29, %v222_v35  ;;  %v342_v58 = vmul.f32 %v1038_v16, %v1193_v38  ;;  %v905_v33 = vld [vmem:[%s2129_s1 + $0x1b8] sm:$0xff] }
  0x1c   :  { %v332_v61 = vadd.f32 %v331_v50, %v320_v31  ;;  %v353_v37 = vmul.f32 %v1043_v17, %v1203_v51  ;;  %v407_v1 = vmul.f32 %v1028_v14, %v1206_v36  ;;  %v1228_v2 = vmul.f32 %v896_v48, %v1045_v18  ;;  %v903_v31 = vld [vmem:[%s2129_s1 + $0x1a8] sm:$0xff] }
  0x1d   :  { %2271 = vst [vmem:[#allocation16_spill] sm:$0xff] %v1213_v57  ;;  %v676_v6 = vadd.f32 %v675_v52, %v571_v55  ;;  %v165_v19 = vadd.f32 %v164_v56, %v88_v49  ;;  %v240_v24 = vmul.f32 %v1017_v9, %v1213_v57  ;;  %v1236_v25 = vmul.f32 %v897_v54, %v1045_v18  ;;  %v902_v52 = vld [vmem:[%s2129_s1 + $0x1a0] sm:$0xff]  ;;  %v907_v55 = vld [vmem:[%s2129_s1 + $0x1c8] sm:$0xff] }
  0x1e   :  { %v343_v26 = vadd.f32 %v342_v58, %v332_v61  ;;  %v418_v10 = vmul.f32 %v1033_v15, %v1228_v2  ;;  %v1241_v27 = vmul.f32 %v898_v59, %v1045_v18  ;;  %v1244_v29 = vmul.f32 %v900_v60, %v1045_v18  ;;  %v906_v54 = vld [vmem:[%s2129_s1 + $0x1c0] sm:$0xff] }
  0x1f   :  { %v741_v35 = vadd.f32 %v740_v53, %v676_v6  ;;  %v241_v48 = vadd.f32 %v240_v24, %v165_v19  ;;  %v429_v49 = vmul.f32 %v1038_v16, %v1236_v25  ;;  %v1258_v50 = vmul.f32 %v901_v3, %v1045_v18 }
  0x20   :  { %v1266_v56 = vadd.f32 %v353_v37, %v343_v26  ;;  %v419_v58 = vadd.f32 %v418_v10, %v407_v1  ;;  %v440_v53 = vmul.f32 %v1043_v17, %v1241_v27  ;;  %v494_v59 = vmul.f32 %v1028_v14, %v1244_v29  ;;  %v908_v26 = vld [vmem:[%s2129_s1 + $0x1d0] sm:$0xff]  ;;  %v919_v10 = vld [vmem:[%s2129_s1 + $0x220] sm:$0xff] }
  0x21   :  { %803 = vst.msk [vmem:[%s2130_s2] sm:$0xff] %vm802_vm0, %v741_v35  ;;  %v505_v60 = vmul.f32 %v1033_v15, %v1258_v50  ;;  %v1279_v61 = vmul.f32 %v902_v52, %v1045_v18  ;;  %v1282_v37 = vmul.f32 %v903_v31, %v1045_v18  ;;  %v1285_v1 = vmul.f32 %v905_v33, %v1045_v18  ;;  %v920_v52 = vld [vmem:[%s2129_s1 + $0x228] sm:$0xff] }
  0x22   :  { %2272 = vst [vmem:[#allocation17_spill] sm:$0xff] %v1266_v56  ;;  %v361_v3 = vmul.f32 %v1028_v14, %v1266_v56  ;;  %v430_v6 = vadd.f32 %v429_v49, %v419_v58  ;;  %v1290_v19 = vmul.f32 %v906_v54, %v1045_v18  ;;  %v1293_v24 = vmul.f32 %v907_v55, %v1045_v18  ;;  %v922_v54 = vld [vmem:[%s2129_s1 + $0x238] sm:$0xff]  ;;  %v923_v55 = vld [vmem:[%s2129_s1 + $0x240] sm:$0xff] }
  0x23   :  { %v506_v31 = vadd.f32 %v505_v60, %v494_v59  ;;  %v516_v33 = vmul.f32 %v1038_v16, %v1279_v61  ;;  %v527_v35 = vmul.f32 %v1043_v17, %v1282_v37  ;;  %v581_v49 = vmul.f32 %v1028_v14, %v1285_v1 }
  0x24   :  { %v362_v58 = vadd.f32 %v361_v3, %v241_v48  ;;  %v1316_v42 = vadd.f32 %v440_v53, %v430_v6  ;;  %v592_v59 = vmul.f32 %v1033_v15, %v1290_v19  ;;  %v603_v60 = vmul.f32 %v1038_v16, %v1293_v24 }
  0x25   :  { %v517_v41 = vadd.f32 %v516_v33, %v506_v31  ;;  %v1323_v56 = vmul.f32 %v908_v26, %v1045_v18  ;;  %v1326_v23 = vmul.f32 %v919_v10, %v1078_v30  ;;  %v1329_v22 = vmul.f32 %v920_v52, %v1078_v30  ;;  %v1342_v18 = vld [vmem:[%s2129_s1 + $0x8] sm:$0xff] }
  0x26   :  { %2273 = vst [vmem:[#allocation18_spill] sm:$0xff] %v1316_v42  ;;  %v448_v48 = vmul.f32 %v1033_v15, %v1316_v42  ;;  %v593_v53 = vadd.f32 %v592_v59, %v581_v49  ;;  %v1334_v3 = vmul.f32 %v922_v54, %v1078_v30  ;;  %v1337_v6 = vmul.f32 %v923_v55, %v1078_v30  ;;  %v1347_v26 = vld [vmem:[%s2129_s1 + $0x28] sm:$0xff] }
  0x27   :  { %2274 = vst [vmem:[#allocation19_spill] sm:$0xff] %v1342_v18  ;;  %v1349_v10 = vadd.f32 %v527_v35, %v517_v41  ;;  %v614_v52 = vmul.f32 %v1043_v17, %v1323_v56  ;;  %v686_v31 = vmul.f32 %v1100_v39, %v1326_v23  ;;  %v697_v30 = vmul.f32 %v1105_v40, %v1329_v22  ;;  %v1360_v33 = vld [vmem:[%s2129_s1 + $0x48] sm:$0xff] }
  0x28   :  { %2275 = vst [vmem:[#allocation20_spill] sm:$0xff] %v1347_v26  ;;  %v449_v49 = vadd.f32 %v448_v48, %v362_v58  ;;  %v604_v54 = vadd.f32 %v603_v60, %v593_v53  ;;  %v751_v41 = vmul.f32 %v1100_v39, %v1334_v3  ;;  %v762_v35 = vmul.f32 %v1105_v40, %v1337_v6 }
  0x29   :  { %2276 = vst [vmem:[#allocation21_spill] sm:$0xff] %v1349_v10  ;;  %v535_v55 = vmul.f32 %v1038_v16, %v1349_v10  ;;  %v1368_v59 = vadd.f32 %v697_v30, %v686_v31  ;;  %v60_v42 = vmul.f32 %v1342_v18, %v1113_v43  ;;  %v71_v57 = vmul.f32 %v1347_v26, %v1115_v44 }
  0x2a   :  { %2277 = vst [vmem:[#allocation22_spill] sm:$0xff] %v1360_v33  ;;  %v1374_v34 = vadd.f32 %v614_v52, %v604_v54  ;;  %v1376_v58 = vadd.f32 %v762_v35, %v751_v41  ;;  %v82_v60 = vmul.f32 %v1360_v33, %v1117_v45  ;;  %v136_v48 = vmul.f32 %v1342_v18, %v1119_v46  ;;  %v1389_v52 = vld [vmem:[%s2129_s1 + $0xc8] sm:$0xff] }
  0x2b   :  { %2278 = vst [vmem:[#allocation23_spill] sm:$0xff] %v1368_v59  ;;  %v536_v53 = vadd.f32 %v535_v55, %v449_v49  ;;  %v705_v31 = vmul.f32 %v1100_v39, %v1368_v59  ;;  %v72_v30 = vadd.f32 %v71_v57, %v60_v42  ;;  %v147_v10 = vmul.f32 %v1347_v26, %v1121_v47  ;;  %v1394_v54 = vld [vmem:[%s2129_s1 + $0xe8] sm:$0xff] }
  0x2c   :  { %2279 = vst [vmem:[#allocation24_spill] sm:$0xff] %v1374_v34  ;;  %v1399_v49 = vld [vmem:[%s2129_s1 + $0x108] sm:$0xff]  ;;  %v622_v42 = vmul.f32 %v1043_v17, %v1374_v34  ;;  %v770_v57 = vmul.f32 %v1105_v40, %v1376_v58  ;;  %v158_v41 = vmul.f32 %v1360_v33, %v1152_v62  ;;  %v212_v35 = vmul.f32 %v1342_v18, %v1154_v63 }
  0x2d   :  { %2280 = vst [vmem:[#allocation25_spill] sm:$0xff] %v1376_v58  ;;  %v1412_v55 = vld [vmem:[%s2129_s1 + $0x128] sm:$0xff]  ;;  %v1414_v59 = vadd.f32 %v82_v60, %v72_v30  ;;  %v148_v28 = vadd.f32 %v147_v10, %v136_v48  ;;  %v223_v34 = vmul.f32 %v1347_v26, %v1156_v0  ;;  %v234_v58 = vmul.f32 %v1360_v33, %v1161_v4 }
  0x2e   :  { %2281 = vst [vmem:[#allocation26_spill] sm:$0xff] %v1389_v52  ;;  %v623_v21 = vadd.f32 %v622_v42, %v536_v53  ;;  %v322_v20 = vmul.f32 %v1389_v52, %v1164_v5  ;;  %v333_v13 = vmul.f32 %v1394_v54, %v1188_v32  ;;  %v344_v12 = vmul.f32 %v1399_v49, %v1193_v38 }
  0x2f   :  { %2282 = vst [vmem:[#allocation27_spill] sm:$0xff] %v1394_v54  ;;  %v90_v60 = vmul.f32 %v1414_v59, %v1007_v7  ;;  %v1428_v10 = vadd.f32 %v158_v41, %v148_v28  ;;  %v224_v48 = vadd.f32 %v223_v34, %v212_v35  ;;  %v355_v30 = vmul.f32 %v1412_v55, %v1203_v51 }
  0x30   :  { %2283 = vst [vmem:[#allocation28_spill] sm:$0xff] %v1399_v49  ;;  %v706_v33 = vadd.f32 %v705_v31, %v623_v21  ;;  %v334_v53 = vadd.f32 %v333_v13, %v322_v20  ;;  %v409_v42 = vmul.f32 %v1389_v52, %v1206_v36  ;;  %v420_v26 = vmul.f32 %v1394_v54, %v1228_v2 }
  0x31   :  { %2284 = vst [vmem:[#allocation29_spill] sm:$0xff] %v1412_v55  ;;  %v166_v18 = vmul.f32 %v1012_v8, %v1428_v10  ;;  %v1438_v11 = vadd.f32 %v234_v58, %v224_v48  ;;  %v431_v28 = vmul.f32 %v1399_v49, %v1236_v25  ;;  %v442_v34 = vmul.f32 %v1412_v55, %v1241_v27 }
  0x32   :  { %2285 = vst [vmem:[#allocation30_spill] sm:$0xff] %v1414_v59  ;;  %v771_v41 = vadd.f32 %v770_v57, %v706_v33  ;;  %v345_v21 = vadd.f32 %v344_v12, %v334_v53  ;;  %v421_v13 = vadd.f32 %v420_v26, %v409_v42  ;;  %v496_v20 = vmul.f32 %v1389_v52, %v1244_v29  ;;  %v1470_v57 = vld [vmem:[%s2129_s1 + $0x208] sm:$0xff] }
  0x33   :  { %2286 = vst [vmem:[#allocation31_spill] sm:$0xff] %v1428_v10  ;;  %v167_v31 = vadd.f32 %v166_v18, %v90_v60  ;;  %v242_v35 = vmul.f32 %v1017_v9, %v1438_v11  ;;  %v507_v58 = vmul.f32 %v1394_v54, %v1258_v50  ;;  %v518_v48 = vmul.f32 %v1399_v49, %v1279_v61  ;;  %v1455_v10 = vld [vmem:[%s2129_s1 + $0x1e8] sm:$0xff] }
  0x34   :  { %2287 = vst [vmem:[#allocation32_spill] sm:$0xff] %v1438_v11  ;;  %v1461_v12 = vadd.f32 %v355_v30, %v345_v21  ;;  %v432_v18 = vadd.f32 %v431_v28, %v421_v13  ;;  %v529_v26 = vmul.f32 %v1412_v55, %v1282_v37  ;;  %v583_v33 = vmul.f32 %v1389_v52, %v1285_v1  ;;  %v1479_v28 = vld [vmem:[%s2129_s1 + $0x10] sm:$0xff] }
  0x35   :  { %2288 = vst [vmem:[#allocation33_spill] sm:$0xff] %v1455_v10  ;;  %v243_v60 = vadd.f32 %v242_v35, %v167_v31  ;;  %v508_v53 = vadd.f32 %v507_v58, %v496_v20  ;;  %v594_v42 = vmul.f32 %v1394_v54, %v1290_v19  ;;  %v605_v30 = vmul.f32 %v1399_v49, %v1293_v24  ;;  %v1492_v31 = vld [vmem:[%s2129_s1 + $0x30] sm:$0xff] }
  0x36   :  { %804 = vst.msk [vmem:[%s2131_s3] sm:$0xff] %vm802_vm0, %v771_v41  ;;  %v363_v41 = vmul.f32 %v1028_v14, %v1461_v12  ;;  %v1483_v21 = vadd.f32 %v442_v34, %v432_v18  ;;  %v616_v13 = vmul.f32 %v1412_v55, %v1323_v56  ;;  %v688_v20 = vmul.f32 %v1455_v10, %v1326_v23  ;;  %v1501_v18 = vld [vmem:[%s2129_s1 + $0x50] sm:$0xff] }
  0x37   :  { %2289 = vst [vmem:[#allocation34_spill] sm:$0xff] %v1461_v12  ;;  %v519_v35 = vadd.f32 %v518_v48, %v508_v53  ;;  %v595_v58 = vadd.f32 %v594_v42, %v583_v33  ;;  %v699_v11 = vmul.f32 %v1470_v57, %v1329_v22  ;;  %v753_v34 = vmul.f32 %v1455_v10, %v1334_v3 }
  0x38   :  { %2290 = vst [vmem:[#allocation35_spill] sm:$0xff] %v1470_v57  ;;  %v364_v12 = vadd.f32 %v363_v41, %v243_v60  ;;  %v450_v59 = vmul.f32 %v1033_v15, %v1483_v21  ;;  %v764_v55 = vmul.f32 %v1470_v57, %v1337_v6  ;;  %v62_v48 = vmul.f32 %v1479_v28, %v1113_v43 }
  0x39   :  { %2291 = vst [vmem:[#allocation36_spill] sm:$0xff] %v1479_v28  ;;  %v1509_v33 = vadd.f32 %v529_v26, %v519_v35  ;;  %v606_v53 = vadd.f32 %v605_v30, %v595_v58  ;;  %v1511_v42 = vadd.f32 %v699_v11, %v688_v20  ;;  %v73_v10 = vmul.f32 %v1492_v31, %v1115_v44  ;;  %v1548_v35 = vld [vmem:[%s2129_s1 + $0x110] sm:$0xff] }
  0x3a   :  { %2292 = vst [vmem:[#allocation37_spill] sm:$0xff] %v1483_v21  ;;  %v451_v49 = vadd.f32 %v450_v59, %v364_v12  ;;  %v1515_v54 = vadd.f32 %v764_v55, %v753_v34  ;;  %v84_v60 = vmul.f32 %v1501_v18, %v1117_v45  ;;  %v138_v41 = vmul.f32 %v1479_v28, %v1119_v46  ;;  %v1530_v59 = vld [vmem:[%s2129_s1 + $0xd0] sm:$0xff] }
  0x3b   :  { %2293 = vst [vmem:[#allocation38_spill] sm:$0xff] %v1492_v31  ;;  %v537_v21 = vmul.f32 %v1038_v16, %v1509_v33  ;;  %v1523_v26 = vadd.f32 %v616_v13, %v606_v53  ;;  %v707_v11 = vmul.f32 %v1100_v39, %v1511_v42  ;;  %v74_v30 = vadd.f32 %v73_v10, %v62_v48  ;;  %v1535_v55 = vld [vmem:[%s2129_s1 + $0xf0] sm:$0xff] }
  0x3c   :  { %2294 = vst [vmem:[#allocation39_spill] sm:$0xff] %v1501_v18  ;;  %v772_v12 = vmul.f32 %v1105_v40, %v1515_v54  ;;  %v149_v13 = vmul.f32 %v1492_v31, %v1121_v47  ;;  %v160_v20 = vmul.f32 %v1501_v18, %v1152_v62  ;;  %v214_v10 = vmul.f32 %v1479_v28, %v1154_v63 }
  0x3d   :  { %2295 = vst [vmem:[#allocation40_spill] sm:$0xff] %v1509_v33  ;;  %v538_v58 = vadd.f32 %v537_v21, %v451_v49  ;;  %v624_v34 = vmul.f32 %v1043_v17, %v1523_v26  ;;  %v1552_v48 = vadd.f32 %v84_v60, %v74_v30  ;;  %v225_v53 = vmul.f32 %v1492_v31, %v1156_v0 }
  0x3e   :  { %2296 = vst [vmem:[#allocation41_spill] sm:$0xff] %v1511_v42  ;;  %v150_v28 = vadd.f32 %v149_v13, %v138_v41  ;;  %v236_v42 = vmul.f32 %v1501_v18, %v1161_v4  ;;  %v324_v49 = vmul.f32 %v1530_v59, %v1164_v5  ;;  %v335_v21 = vmul.f32 %v1535_v55, %v1188_v32 }
  0x3f   :  { %2297 = vst [vmem:[#allocation42_spill] sm:$0xff] %v1515_v54  ;;  %v1559_v54 = vld [vmem:[%s2129_s1 + $0x130] sm:$0xff]  ;;  %v625_v60 = vadd.f32 %v624_v34, %v538_v58  ;;  %v92_v30 = vmul.f32 %v1552_v48, %v1007_v7  ;;  %v226_v31 = vadd.f32 %v225_v53, %v214_v10  ;;  %v411_v18 = vmul.f32 %v1530_v59, %v1206_v36 }
  0x40   :  { %2298 = vst [vmem:[#allocation43_spill] sm:$0xff] %v1523_v26  ;;  %v346_v26 = vmul.f32 %v1548_v35, %v1193_v38  ;;  %v1571_v33 = vadd.f32 %v160_v20, %v150_v28  ;;  %v336_v41 = vadd.f32 %v335_v21, %v324_v49  ;;  %v357_v13 = vmul.f32 %v1559_v54, %v1203_v51 }
  0x41   :  { %2299 = vst [vmem:[#allocation44_spill] sm:$0xff] %v1530_v59  ;;  %v708_v57 = vadd.f32 %v707_v11, %v625_v60  ;;  %v1577_v52 = vadd.f32 %v236_v42, %v226_v31  ;;  %v422_v58 = vmul.f32 %v1535_v55, %v1228_v2  ;;  %v433_v10 = vmul.f32 %v1548_v35, %v1236_v25 }
  0x42   :  { %2300 = vst [vmem:[#allocation45_spill] sm:$0xff] %v1535_v55  ;;  %v168_v28 = vmul.f32 %v1012_v8, %v1571_v33  ;;  %v347_v20 = vadd.f32 %v346_v26, %v336_v41  ;;  %v444_v34 = vmul.f32 %v1559_v54, %v1241_v27  ;;  %v498_v53 = vmul.f32 %v1530_v59, %v1244_v29 }
  0x43   :  { %2301 = vst [vmem:[#allocation46_spill] sm:$0xff] %v1548_v35  ;;  %v773_v49 = vadd.f32 %v772_v12, %v708_v57  ;;  %v244_v31 = vmul.f32 %v1017_v9, %v1577_v52  ;;  %v423_v42 = vadd.f32 %v422_v58, %v411_v18  ;;  %v509_v11 = vmul.f32 %v1535_v55, %v1258_v50  ;;  %v1602_v57 = vld [vmem:[%s2129_s1 + $0x1f0] sm:$0xff] }
  0x44   :  { %2302 = vst [vmem:[#allocation47_spill] sm:$0xff] %v1552_v48  ;;  %v169_v21 = vadd.f32 %v168_v28, %v92_v30  ;;  %v1593_v60 = vadd.f32 %v357_v13, %v347_v20  ;;  %v520_v26 = vmul.f32 %v1548_v35, %v1279_v61  ;;  %v531_v41 = vmul.f32 %v1559_v54, %v1282_v37  ;;  %v1615_v58 = vld [vmem:[%s2129_s1 + $0x210] sm:$0xff] }
  0x45   :  { %2303 = vst [vmem:[#allocation48_spill] sm:$0xff] %v1559_v54  ;;  %v434_v18 = vadd.f32 %v433_v10, %v423_v42  ;;  %v510_v12 = vadd.f32 %v509_v11, %v498_v53  ;;  %v585_v30 = vmul.f32 %v1530_v59, %v1285_v1  ;;  %v596_v13 = vmul.f32 %v1535_v55, %v1290_v19  ;;  %v1626_v53 = vld [vmem:[%s2129_s1 + $0x18] sm:$0xff] }
  0x46   :  { %2304 = vst [vmem:[#allocation49_spill] sm:$0xff] %v1571_v33  ;;  %v245_v28 = vadd.f32 %v244_v31, %v169_v21  ;;  %v365_v20 = vmul.f32 %v1028_v14, %v1593_v60  ;;  %v618_v10 = vmul.f32 %v1559_v54, %v1323_v56  ;;  %v690_v31 = vmul.f32 %v1602_v57, %v1326_v23  ;;  %v1635_v21 = vld [vmem:[%s2129_s1 + $0x38] sm:$0xff] }
  0x47   :  { %2305 = vst [vmem:[#allocation50_spill] sm:$0xff] %v1577_v52  ;;  %v1628_v42 = vadd.f32 %v444_v34, %v434_v18  ;;  %v521_v11 = vadd.f32 %v520_v26, %v510_v12  ;;  %v597_v55 = vadd.f32 %v596_v13, %v585_v30  ;;  %v1640_v54 = vld [vmem:[%s2129_s1 + $0x58] sm:$0xff]  ;;  %v701_v34 = vmul.f32 %v1615_v58, %v1329_v22 }
  0x48   :  { %2306 = vst [vmem:[#allocation51_spill] sm:$0xff] %v1593_v60  ;;  %v755_v26 = vmul.f32 %v1602_v57, %v1334_v3  ;;  %v766_v18 = vmul.f32 %v1615_v58, %v1337_v6  ;;  %v64_v59 = vmul.f32 %v1626_v53, %v1113_v43 }
  0x49   :  { %2307 = vst [vmem:[#allocation52_spill] sm:$0xff] %v1602_v57  ;;  %v452_v12 = vmul.f32 %v1033_v15, %v1628_v42  ;;  %v1650_v30 = vadd.f32 %v531_v41, %v521_v11  ;;  %v1654_v60 = vadd.f32 %v701_v34, %v690_v31  ;;  %v86_v57 = vmul.f32 %v1640_v54, %v1117_v45  ;;  %v1677_v45 = vld [vmem:[%s2129_s1 + $0xd8] sm:$0xff] }
  0x4a   :  { %924 = vst.msk [vmem:[%s2131_s3 + $0x8] sm:$0xff] %vm802_vm0, %v773_v49  ;;  %v607_v49 = vmul.f32 %v1548_v35, %v1293_v24  ;;  %v366_v35 = vadd.f32 %v365_v20, %v245_v28  ;;  %v1656_v28 = vadd.f32 %v766_v18, %v755_v26  ;;  %v75_v20 = vmul.f32 %v1635_v21, %v1115_v44  ;;  %v1698_v34 = vld [vmem:[%s2129_s1 + $0x138] sm:$0xff] }
  0x4b   :  { %2308 = vst [vmem:[#allocation53_spill] sm:$0xff] %v1615_v58  ;;  %v709_v43 = vmul.f32 %v1100_v39, %v1654_v60  ;;  %v151_v44 = vmul.f32 %v1635_v21, %v1121_v47  ;;  %v162_v47 = vmul.f32 %v1640_v54, %v1152_v62  ;;  %v216_v31 = vmul.f32 %v1626_v53, %v1154_v63 }
  0x4c   :  { %2309 = vst [vmem:[#allocation54_spill] sm:$0xff] %v1626_v53  ;;  %v608_v13 = vadd.f32 %v607_v49, %v597_v55  ;;  %v453_v58 = vadd.f32 %v452_v12, %v366_v35  ;;  %v140_v55 = vmul.f32 %v1626_v53, %v1119_v46  ;;  %v774_v49 = vmul.f32 %v1105_v40, %v1656_v28  ;;  %v1682_v35 = vld [vmem:[%s2129_s1 + $0xf8] sm:$0xff]  ;;  %v2350_v53 = vld [vmem:[#allocation34_spill] sm:$0xff] }
  0x4d   :  { %2310 = vst [vmem:[#allocation55_spill] sm:$0xff] %v1628_v42  ;;  %v539_v42 = vmul.f32 %v1038_v16, %v1650_v30  ;;  %v76_v11 = vadd.f32 %v75_v20, %v64_v59  ;;  %v1687_v46 = vld [vmem:[%s2129_s1 + $0x118] sm:$0xff]  ;;  %v326_v62 = vmul.f32 %v1677_v45, %v1164_v5  ;;  %v337_v63 = vmul.f32 %v1682_v35, %v1188_v32 }
  0x4e   :  { %2311 = vst [vmem:[#allocation56_spill] sm:$0xff] %v1635_v21  ;;  %v1664_v41 = vadd.f32 %v618_v10, %v608_v13  ;;  %v152_v18 = vadd.f32 %v151_v44, %v140_v55  ;;  %v348_v13 = vmul.f32 %v1687_v46, %v1193_v38  ;;  %v413_v5 = vmul.f32 %v1677_v45, %v1206_v36 }
  0x4f   :  { %2312 = vst [vmem:[#allocation57_spill] sm:$0xff] %v1640_v54  ;;  %v540_v10 = vadd.f32 %v539_v42, %v453_v58  ;;  %v1700_v26 = vadd.f32 %v86_v57, %v76_v11  ;;  %v227_v58 = vmul.f32 %v1635_v21, %v1156_v0  ;;  %v238_v42 = vmul.f32 %v1640_v54, %v1161_v4  ;;  %v2349_v21 = vld [vmem:[#allocation24_spill] sm:$0xff] }
  0x50   :  { %2313 = vst [vmem:[#allocation58_spill] sm:$0xff] %v1650_v30  ;;  %v626_v59 = vmul.f32 %v1043_v17, %v1664_v41  ;;  %v1714_v20 = vadd.f32 %v162_v47, %v152_v18  ;;  %v359_v0 = vmul.f32 %v1698_v34, %v1203_v51  ;;  %v338_v11 = vadd.f32 %v337_v63, %v326_v62 }
  0x51   :  { %2314 = vst [vmem:[#allocation59_spill] sm:$0xff] %v1677_v45  ;;  %v94_v57 = vmul.f32 %v1700_v26, %v1007_v7  ;;  %v228_v55 = vadd.f32 %v227_v58, %v216_v31  ;;  %v424_v32 = vmul.f32 %v1682_v35, %v1228_v2  ;;  %v435_v7 = vmul.f32 %v1687_v46, %v1236_v25  ;;  %v1741_v25 = vld [vmem:[%s2129_s1 + $0x1f8] sm:$0xff] }
  0x52   :  { %2315 = vst [vmem:[#allocation60_spill] sm:$0xff] %v1682_v35  ;;  %v627_v12 = vadd.f32 %v626_v59, %v540_v10  ;;  %v170_v38 = vmul.f32 %v1012_v8, %v1714_v20  ;;  %v446_v10 = vmul.f32 %v1698_v34, %v1241_v27  ;;  %v500_v36 = vmul.f32 %v1677_v45, %v1244_v29 }
  0x53   :  { %2316 = vst [vmem:[#allocation61_spill] sm:$0xff] %v1687_v46  ;;  %v1724_v44 = vadd.f32 %v238_v42, %v228_v55  ;;  %v425_v59 = vadd.f32 %v424_v32, %v413_v5  ;;  %v511_v8 = vmul.f32 %v1682_v35, %v1258_v50  ;;  %v522_v31 = vmul.f32 %v1687_v46, %v1279_v61  ;;  %v1756_v61 = vld [vmem:[%s2129_s1 + $0x218] sm:$0xff]  ;;  %v2324_v32 = vld [vmem:[#allocation6_spill] sm:$0xff] }
  0x54   :  { %2317 = vst [vmem:[#allocation62_spill] sm:$0xff] %v1698_v34  ;;  %v710_v4 = vadd.f32 %v709_v43, %v627_v12  ;;  %v349_v43 = vadd.f32 %v348_v13, %v338_v11  ;;  %v171_v47 = vadd.f32 %v170_v38, %v94_v57  ;;  %v587_v50 = vmul.f32 %v1677_v45, %v1285_v1 }
  0x55   :  { %2318 = vst [vmem:[#allocation63_spill] sm:$0xff] %v1724_v44  ;;  %v246_v2 = vmul.f32 %v1017_v9, %v1724_v44  ;;  %v436_v29 = vadd.f32 %v435_v7, %v425_v59  ;;  %v533_v9 = vmul.f32 %v1698_v34, %v1282_v37  ;;  %v512_v18 = vadd.f32 %v511_v8, %v500_v36  ;;  %v2328_v36 = vld [vmem:[#allocation8_spill] sm:$0xff] }
  0x56   :  { %v775_v51 = vadd.f32 %v774_v49, %v710_v4  ;;  %2319 = vst [vmem:[#allocation64_spill] sm:$0xff] %v1741_v25  ;;  %v1747_v27 = vadd.f32 %v359_v0, %v349_v43  ;;  %v598_v58 = vmul.f32 %v1682_v35, %v1290_v19  ;;  %v609_v42 = vmul.f32 %v1687_v46, %v1293_v24  ;;  %v2321_v0 = vld [vmem:[#allocation5_spill] sm:$0xff]  ;;  %v2345_v46 = vld [vmem:[#allocation32_spill] sm:$0xff] }
  0x57   :  { %2320 = vst [vmem:[#allocation65_spill] sm:$0xff] %v1756_v61  ;;  %v247_v49 = vadd.f32 %v246_v2, %v171_v47  ;;  %v1764_v37 = vadd.f32 %v446_v10, %v436_v29  ;;  %v620_v1 = vmul.f32 %v1698_v34, %v1323_v56  ;;  %v692_v62 = vmul.f32 %v1741_v25, %v1326_v23  ;;  %v2322_v56 = vld [vmem:[#allocation19_spill] sm:$0xff]  ;;  %v2329_v47 = vld [vmem:[#allocation26_spill] sm:$0xff] }
  0x58   :  { %925 = vst.msk [vmem:[%s2131_s3 + $0x10] sm:$0xff] %vm802_vm0, %v775_v51  ;;  %v367_v12 = vmul.f32 %v1028_v14, %v1747_v27  ;;  %v523_v63 = vadd.f32 %v522_v31, %v512_v18  ;;  %v599_v13 = vadd.f32 %v598_v58, %v587_v50  ;;  %v703_v57 = vmul.f32 %v1756_v61, %v1329_v22  ;;  %v2325_v22 = vld [vmem:[#allocation20_spill] sm:$0xff]  ;;  %v2326_v10 = vld [vmem:[#allocation7_spill] sm:$0xff]  ;;  %v2327_v51 = vld [vmem:[#allocation22_spill] sm:$0xff] }
  0x59   :  { %v757_v19 = vmul.f32 %v1741_v25, %v1334_v3  ;;  %v454_v14 = vmul.f32 %v1033_v15, %v1764_v37  ;;  %v768_v55 = vmul.f32 %v1756_v61, %v1337_v6  ;;  %v49_v4 = vmul.f32 %v2322_v56, %v2321_v0  ;;  %v2330_v50 = vld [vmem:[#allocation9_spill] sm:$0xff]  ;;  %v2332_v58 = vld [vmem:[#allocation14_spill] sm:$0xff]  ;;  %v2344_v25 = vld [vmem:[#allocation31_spill] sm:$0xff] }
  0x5a   :  { %v368_v24 = vadd.f32 %v367_v12, %v247_v49  ;;  %v1780_v11 = vadd.f32 %v533_v9, %v523_v63  ;;  %v610_v23 = vadd.f32 %v609_v42, %v599_v13  ;;  %v1782_v5 = vadd.f32 %v703_v57, %v692_v62  ;;  %v2331_v49 = vld [vmem:[#allocation27_spill] sm:$0xff]  ;;  %v2335_v57 = vld [vmem:[#allocation10_spill] sm:$0xff] }
  0x5b   :  { %v125_v38 = vmul.f32 %v2325_v22, %v2324_v32  ;;  %v1786_v3 = vadd.f32 %v768_v55, %v757_v19  ;;  %v201_v15 = vmul.f32 %v2327_v51, %v2326_v10  ;;  %v311_v2 = vmul.f32 %v2329_v47, %v2328_v36  ;;  %v2333_v42 = vld [vmem:[#allocation15_spill] sm:$0xff] }
  0x5c   :  { %2323 = vst [vmem:[#allocation5_spill] sm:$0xff] %v1780_v11  ;;  %v455_v7 = vadd.f32 %v454_v14, %v368_v24  ;;  %v541_v6 = vmul.f32 %v1038_v16, %v1780_v11  ;;  %v1792_v43 = vadd.f32 %v620_v1, %v610_v23  ;;  %v711_v8 = vmul.f32 %v1100_v39, %v1782_v5  ;;  %v2334_v1 = vld [vmem:[#allocation16_spill] sm:$0xff]  ;;  %v2337_v24 = vld [vmem:[#allocation11_spill] sm:$0xff]  ;;  %v2338_v14 = vld [vmem:[#allocation29_spill] sm:$0xff] }
  0x5d   :  { %v126_v59 = vadd.f32 %v125_v38, %v49_v4  ;;  %v398_v18 = vmul.f32 %v2331_v49, %v2330_v50  ;;  %v96_v16 = vmul.f32 %v2322_v56, %v2332_v58  ;;  %v172_v12 = vmul.f32 %v2325_v22, %v2333_v42  ;;  %v2339_v23 = vld [vmem:[#allocation17_spill] sm:$0xff] }
  0x5e   :  { %v542_v31 = vadd.f32 %v541_v6, %v455_v7  ;;  %v628_v29 = vmul.f32 %v1043_v17, %v1792_v43  ;;  %v248_v62 = vmul.f32 %v2327_v51, %v2334_v1  ;;  %v776_v39 = vmul.f32 %v1105_v40, %v1786_v3  ;;  %v2336_v17 = vld [vmem:[#allocation28_spill] sm:$0xff] }
  0x5f   :  { %v202_v9 = vadd.f32 %v201_v15, %v126_v59  ;;  %v485_v19 = vmul.f32 %v2336_v17, %v2335_v57  ;;  %v572_v55 = vmul.f32 %v2338_v14, %v2337_v24  ;;  %v173_v4 = vadd.f32 %v172_v12, %v96_v16  ;;  %v2340_v6 = vld [vmem:[#allocation12_spill] sm:$0xff]  ;;  %v2341_v59 = vld [vmem:[#allocation33_spill] sm:$0xff] }
  0x60   :  { %v629_v63 = vadd.f32 %v628_v29, %v542_v31  ;;  %v369_v38 = vmul.f32 %v2329_v47, %v2339_v23  ;;  %v677_v61 = vmul.f32 %v2341_v59, %v2340_v6  ;;  %v2342_v31 = vld [vmem:[#allocation30_spill] sm:$0xff]  ;;  %v174_v34 = vmul.f32 %v2325_v22, %v2344_v25  ;;  %v2355_v25 = vld [vmem:[#allocation40_spill] sm:$0xff] }
  0x61   :  { %v312_v13 = vadd.f32 %v311_v2, %v202_v9  ;;  %v98_v29 = vmul.f32 %v2322_v56, %v2342_v31  ;;  %v249_v40 = vadd.f32 %v248_v62, %v173_v4  ;;  %v2343_v2 = vld [vmem:[#allocation18_spill] sm:$0xff]  ;;  %v250_v16 = vmul.f32 %v2327_v51, %v2345_v46 }
  0x62   :  { %v712_v7 = vadd.f32 %v711_v8, %v629_v63  ;;  %v456_v9 = vmul.f32 %v2331_v49, %v2343_v2  ;;  %v2346_v8 = vld [vmem:[#allocation13_spill] sm:$0xff]  ;;  %v630_v62 = vmul.f32 %v2338_v14, %v2349_v21  ;;  %v371_v2 = vmul.f32 %v2329_v47, %v2350_v53 }
  0x63   :  { %v399_v15 = vadd.f32 %v398_v18, %v312_v13  ;;  %v2347_v18 = vld [vmem:[#allocation35_spill] sm:$0xff]  ;;  %v2348_v13 = vld [vmem:[#allocation21_spill] sm:$0xff]  ;;  %v370_v54 = vadd.f32 %v369_v38, %v249_v40  ;;  %v175_v4 = vadd.f32 %v174_v34, %v98_v29  ;;  %v176_v38 = vmul.f32 %v2325_v22, %v1571_v33 }
  0x64   :  { %v777_v12 = vadd.f32 %v776_v39, %v712_v7  ;;  %v742_v63 = vmul.f32 %v2347_v18, %v2346_v8  ;;  %v543_v45 = vmul.f32 %v2336_v17, %v2348_v13  ;;  %v2352_v29 = vld [vmem:[#allocation37_spill] sm:$0xff]  ;;  %v252_v21 = vmul.f32 %v2327_v51, %v1577_v52 }
  0x65   :  { %v486_v35 = vadd.f32 %v485_v19, %v399_v15  ;;  %v2351_v19 = vld [vmem:[#allocation23_spill] sm:$0xff]  ;;  %v100_v15 = vmul.f32 %v2322_v56, %v1552_v48  ;;  %v457_v40 = vadd.f32 %v456_v9, %v370_v54  ;;  %v251_v34 = vadd.f32 %v250_v16, %v175_v4 }
  0x66   :  { %926 = vst.msk [vmem:[%s2131_s3 + $0x18] sm:$0xff] %vm802_vm0, %v777_v12  ;;  %v713_v7 = vmul.f32 %v2341_v59, %v2351_v19  ;;  %v458_v53 = vmul.f32 %v2331_v49, %v2352_v29  ;;  %v2353_v12 = vld [vmem:[#allocation25_spill] sm:$0xff]  ;;  %v2354_v19 = vld [vmem:[#allocation51_spill] sm:$0xff]  ;;  %v545_v54 = vmul.f32 %v2336_v17, %v2355_v25 }
  0x67   :  { %v573_v39 = vadd.f32 %v572_v55, %v486_v35  ;;  %v778_v35 = vmul.f32 %v2347_v18, %v2353_v12  ;;  %v177_v55 = vadd.f32 %v176_v38, %v100_v15  ;;  %v373_v8 = vmul.f32 %v2329_v47, %v2354_v19  ;;  %v2356_v9 = vld [vmem:[#allocation43_spill] sm:$0xff] }
  0x68   :  { %v544_v48 = vadd.f32 %v543_v45, %v457_v40  ;;  %v372_v46 = vadd.f32 %v371_v2, %v251_v34  ;;  %v632_v16 = vmul.f32 %v2338_v14, %v2356_v9  ;;  %v2357_v29 = vld [vmem:[#allocation55_spill] sm:$0xff]  ;;  %v178_v45 = vmul.f32 %v2325_v22, %v1714_v20 }
  0x69   :  { %v678_v13 = vadd.f32 %v677_v61, %v573_v39  ;;  %v253_v33 = vadd.f32 %v252_v21, %v177_v55  ;;  %v460_v61 = vmul.f32 %v2331_v49, %v2357_v29  ;;  %v102_v39 = vmul.f32 %v2322_v56, %v1700_v26  ;;  %v2358_v21 = vld [vmem:[#allocation41_spill] sm:$0xff] }
  0x6a   :  { %v631_v15 = vadd.f32 %v630_v62, %v544_v48  ;;  %v459_v38 = vadd.f32 %v458_v53, %v372_v46  ;;  %v254_v2 = vmul.f32 %v2327_v51, %v1724_v44  ;;  %v547_v48 = vmul.f32 %v2336_v17, %v1650_v30 }
  0x6b   :  { %v743_v4 = vadd.f32 %v742_v63, %v678_v13  ;;  %v715_v63 = vmul.f32 %v2341_v59, %v2358_v21  ;;  %v2359_v13 = vld [vmem:[#allocation42_spill] sm:$0xff]  ;;  %v374_v56 = vadd.f32 %v373_v8, %v253_v33  ;;  %v179_v22 = vadd.f32 %v178_v45, %v102_v39  ;;  %v2363_v45 = vld [vmem:[#allocation44_spill] sm:$0xff] }
  0x6c   :  { %v780_v40 = vmul.f32 %v2347_v18, %v2359_v13  ;;  %v714_v53 = vadd.f32 %v713_v7, %v631_v15  ;;  %v546_v46 = vadd.f32 %v545_v54, %v459_v38  ;;  %v375_v51 = vmul.f32 %v2329_v47, %v1747_v27  ;;  %v2361_v7 = vld [vmem:[#allocation38_spill] sm:$0xff]  ;;  %v2362_v15 = vld [vmem:[#allocation39_spill] sm:$0xff] }
  0x6d   :  { %927 = vst.msk [vmem:[%s2130_s2 + $0x8] sm:$0xff] %vm802_vm0, %v743_v4  ;;  %v461_v62 = vadd.f32 %v460_v61, %v374_v56  ;;  %v634_v34 = vmul.f32 %v2338_v14, %v1664_v41  ;;  %v462_v55 = vmul.f32 %v2331_v49, %v1764_v37  ;;  %v2360_v4 = vld [vmem:[#allocation36_spill] sm:$0xff]  ;;  %v255_v44 = vadd.f32 %v254_v2, %v179_v22 }
  0x6e   :  { %v51_v13 = vmul.f32 %v2360_v4, %v2321_v0  ;;  %v779_v33 = vadd.f32 %v778_v35, %v714_v53  ;;  %v633_v8 = vadd.f32 %v632_v16, %v546_v46  ;;  %v127_v54 = vmul.f32 %v2361_v7, %v2324_v32  ;;  %v2364_v53 = vld [vmem:[#allocation45_spill] sm:$0xff] }
  0x6f   :  { %v548_v39 = vadd.f32 %v547_v48, %v461_v62  ;;  %v717_v47 = vmul.f32 %v2341_v59, %v1654_v60  ;;  %v549_v61 = vmul.f32 %v2336_v17, %v1780_v11  ;;  %v203_v38 = vmul.f32 %v2362_v15, %v2326_v10 }
  0x70   :  { %928 = vst.msk [vmem:[%s2131_s3 + $0x20] sm:$0xff] %vm802_vm0, %v779_v33  ;;  %v716_v49 = vadd.f32 %v715_v63, %v633_v8  ;;  %v376_v35 = vadd.f32 %v375_v51, %v255_v44  ;;  %v128_v16 = vadd.f32 %v127_v54, %v51_v13  ;;  %v313_v2 = vmul.f32 %v2363_v45, %v2328_v36  ;;  %v2365_v33 = vld [vmem:[#allocation46_spill] sm:$0xff]  ;;  %v2366_v54 = vld [vmem:[#allocation48_spill] sm:$0xff] }
  0x71   :  { %v635_v56 = vadd.f32 %v634_v34, %v548_v39  ;;  %v782_v48 = vmul.f32 %v2347_v18, %v1656_v28  ;;  %v636_v17 = vmul.f32 %v2338_v14, %v1792_v43  ;;  %v400_v46 = vmul.f32 %v2364_v53, %v2330_v50 }
  0x72   :  { %v781_v22 = vadd.f32 %v780_v40, %v716_v49  ;;  %v463_v62 = vadd.f32 %v462_v55, %v376_v35  ;;  %v204_v11 = vadd.f32 %v203_v38, %v128_v16  ;;  %v104_v44 = vmul.f32 %v2360_v4, %v2332_v58  ;;  %v2367_v16 = vld [vmem:[#allocation52_spill] sm:$0xff] }
  0x73   :  { %v718_v63 = vadd.f32 %v717_v47, %v635_v56  ;;  %v719_v13 = vmul.f32 %v2341_v59, %v1782_v5  ;;  %v180_v51 = vmul.f32 %v2361_v7, %v2333_v42  ;;  %v256_v34 = vmul.f32 %v2362_v15, %v2334_v1 }
  0x74   :  { %929 = vst.msk [vmem:[%s2131_s3 + $0x28] sm:$0xff] %vm802_vm0, %v781_v22  ;;  %v550_v14 = vadd.f32 %v549_v61, %v463_v62  ;;  %v784_v40 = vmul.f32 %v2347_v18, %v1786_v3  ;;  %v314_v55 = vadd.f32 %v313_v2, %v204_v11  ;;  %v487_v8 = vmul.f32 %v2365_v33, %v2335_v57  ;;  %v2368_v2 = vld [vmem:[#allocation18_spill] sm:$0xff]  ;;  %v2376_v57 = vld [vmem:[#allocation37_spill] sm:$0xff] }
  0x75   :  { %v783_v59 = vadd.f32 %v782_v48, %v718_v63  ;;  %v574_v39 = vmul.f32 %v2366_v54, %v2337_v24  ;;  %v181_v47 = vadd.f32 %v180_v51, %v104_v44  ;;  %v377_v38 = vmul.f32 %v2363_v45, %v2339_v23  ;;  %v2369_v48 = vld [vmem:[#allocation31_spill] sm:$0xff]  ;;  %v2371_v63 = vld [vmem:[#allocation13_spill] sm:$0xff] }
  0x76   :  { %v637_v49 = vadd.f32 %v636_v17, %v550_v14  ;;  %v401_v35 = vadd.f32 %v400_v46, %v314_v55  ;;  %v679_v61 = vmul.f32 %v2367_v16, %v2340_v6  ;;  %v106_v18 = vmul.f32 %v2360_v4, %v2342_v31  ;;  %v2370_v17 = vld [vmem:[#allocation32_spill] sm:$0xff]  ;;  %v2372_v51 = vld [vmem:[#allocation53_spill] sm:$0xff] }
  0x77   :  { %930 = vst.msk [vmem:[%s2131_s3 + $0x30] sm:$0xff] %vm802_vm0, %v783_v59  ;;  %v257_v11 = vadd.f32 %v256_v34, %v181_v47  ;;  %v464_v56 = vmul.f32 %v2364_v53, %v2368_v2  ;;  %v182_v22 = vmul.f32 %v2361_v7, %v2369_v48  ;;  %v258_v46 = vmul.f32 %v2362_v15, %v2370_v17  ;;  %v2373_v55 = vld [vmem:[#allocation21_spill] sm:$0xff]  ;;  %v2374_v59 = vld [vmem:[#allocation24_spill] sm:$0xff]  ;;  %v2375_v2 = vld [vmem:[#allocation34_spill] sm:$0xff] }
  0x78   :  { %v720_v62 = vadd.f32 %v719_v13, %v637_v49  ;;  %v488_v44 = vadd.f32 %v487_v8, %v401_v35  ;;  %v744_v14 = vmul.f32 %v2372_v51, %v2371_v63  ;;  %v551_v6 = vmul.f32 %v2365_v33, %v2373_v55  ;;  %v2377_v8 = vld [vmem:[#allocation47_spill] sm:$0xff]  ;;  %v2378_v17 = vld [vmem:[#allocation49_spill] sm:$0xff] }
  0x79   :  { %v378_v31 = vadd.f32 %v377_v38, %v257_v11  ;;  %v638_v34 = vmul.f32 %v2366_v54, %v2374_v59  ;;  %v183_v47 = vadd.f32 %v182_v22, %v106_v18  ;;  %v379_v23 = vmul.f32 %v2363_v45, %v2375_v2 }
  0x7a   :  { %v785_v48 = vadd.f32 %v784_v40, %v720_v62  ;;  %v575_v24 = vadd.f32 %v574_v39, %v488_v44  ;;  %v466_v13 = vmul.f32 %v2364_v53, %v2376_v57  ;;  %v108_v49 = vmul.f32 %v2360_v4, %v2377_v8  ;;  %v2379_v39 = vld [vmem:[#allocation23_spill] sm:$0xff] }
  0x7b   :  { %v465_v35 = vadd.f32 %v464_v56, %v378_v31  ;;  %v259_v63 = vadd.f32 %v258_v46, %v183_v47  ;;  %v184_v38 = vmul.f32 %v2361_v7, %v2378_v17  ;;  %v260_v11 = vmul.f32 %v2362_v15, %v1577_v52 }
  0x7c   :  { %931 = vst.msk [vmem:[%s2131_s3 + $0x38] sm:$0xff] %vm802_vm0, %v785_v48  ;;  %v680_v40 = vadd.f32 %v679_v61, %v575_v24  ;;  %v721_v18 = vmul.f32 %v2367_v16, %v2379_v39  ;;  %v786_v22 = vmul.f32 %v2372_v51, %v2353_v12  ;;  %v553_v31 = vmul.f32 %v2365_v33, %v2355_v25 }
  0x7d   :  { %v552_v56 = vadd.f32 %v551_v6, %v465_v35  ;;  %v380_v46 = vadd.f32 %v379_v23, %v259_v63  ;;  %v185_v62 = vadd.f32 %v184_v38, %v108_v49  ;;  %v381_v44 = vmul.f32 %v2363_v45, %v2354_v19  ;;  %v2381_v38 = vld [vmem:[#allocation42_spill] sm:$0xff] }
  0x7e   :  { %v745_v47 = vadd.f32 %v744_v14, %v680_v40  ;;  %v640_v48 = vmul.f32 %v2366_v54, %v2356_v9  ;;  %v468_v24 = vmul.f32 %v2364_v53, %v2357_v29  ;;  %v110_v61 = vmul.f32 %v2360_v4, %v1700_v26  ;;  %v2380_v14 = vld [vmem:[#allocation63_spill] sm:$0xff] }
  0x7f   :  { %v639_v12 = vadd.f32 %v638_v34, %v552_v56  ;;  %v467_v52 = vadd.f32 %v466_v13, %v380_v46  ;;  %v261_v39 = vadd.f32 %v260_v11, %v185_v62  ;;  %v186_v23 = vmul.f32 %v2361_v7, %v1714_v20  ;;  %v2382_v46 = vld [vmem:[#allocation54_spill] sm:$0xff] }
  0x80   :  { %932 = vst.msk [vmem:[%s2130_s2 + $0x10] sm:$0xff] %vm802_vm0, %v745_v47  ;;  %v723_v6 = vmul.f32 %v2367_v16, %v2358_v21  ;;  %v555_v63 = vmul.f32 %v2365_v33, %v1650_v30  ;;  %v262_v4 = vmul.f32 %v2362_v15, %v2380_v14  ;;  %v383_v34 = vmul.f32 %v2363_v45, %v1747_v27 }
  0x81   :  { %v722_v13 = vadd.f32 %v721_v18, %v639_v12  ;;  %v554_v49 = vadd.f32 %v553_v31, %v467_v52  ;;  %v382_v7 = vadd.f32 %v381_v44, %v261_v39  ;;  %v187_v35 = vadd.f32 %v186_v23, %v110_v61  ;;  %v2383_v39 = vld [vmem:[#allocation56_spill] sm:$0xff]  ;;  %v2384_v31 = vld [vmem:[#allocation57_spill] sm:$0xff] }
  0x82   :  { %v788_v11 = vmul.f32 %v2372_v51, %v2381_v38  ;;  %v642_v40 = vmul.f32 %v2366_v54, %v1664_v41  ;;  %v470_v56 = vmul.f32 %v2364_v53, %v1764_v37  ;;  %v53_v62 = vmul.f32 %v2382_v46, %v2321_v0 }
  0x83   :  { %v787_v15 = vadd.f32 %v786_v22, %v722_v13  ;;  %v641_v47 = vadd.f32 %v640_v48, %v554_v49  ;;  %v469_v30 = vadd.f32 %v468_v24, %v382_v7  ;;  %v263_v45 = vadd.f32 %v262_v4, %v187_v35  ;;  %v2385_v48 = vld [vmem:[#allocation5_spill] sm:$0xff]  ;;  %v2388_v35 = vld [vmem:[#allocation10_spill] sm:$0xff] }
  0x84   :  { %v725_v52 = vmul.f32 %v2367_v16, %v1654_v60  ;;  %v790_v12 = vmul.f32 %v2372_v51, %v1656_v28  ;;  %v129_v18 = vmul.f32 %v2383_v39, %v2324_v32  ;;  %v205_v44 = vmul.f32 %v2384_v31, %v2326_v10  ;;  %v2386_v10 = vld [vmem:[#allocation59_spill] sm:$0xff] }
  0x85   :  { %933 = vst.msk [vmem:[%s2131_s3 + $0x40] sm:$0xff] %vm802_vm0, %v787_v15  ;;  %v724_v0 = vadd.f32 %v723_v6, %v641_v47  ;;  %v556_v53 = vadd.f32 %v555_v63, %v469_v30  ;;  %v384_v22 = vadd.f32 %v383_v34, %v263_v45  ;;  %v557_v24 = vmul.f32 %v2365_v33, %v2385_v48  ;;  %v2387_v63 = vld [vmem:[#allocation60_spill] sm:$0xff]  ;;  %v2392_v47 = vld [vmem:[#allocation17_spill] sm:$0xff] }
  0x86   :  { %v644_v61 = vmul.f32 %v2366_v54, %v1792_v43  ;;  %v727_v32 = vmul.f32 %v2367_v16, %v1782_v5  ;;  %v130_v23 = vadd.f32 %v129_v18, %v53_v62  ;;  %v315_v4 = vmul.f32 %v2386_v10, %v2328_v36  ;;  %v2391_v62 = vld [vmem:[#allocation62_spill] sm:$0xff] }
  0x87   :  { %v789_v13 = vadd.f32 %v788_v11, %v724_v0  ;;  %v643_v49 = vadd.f32 %v642_v40, %v556_v53  ;;  %v471_v7 = vadd.f32 %v470_v56, %v384_v22  ;;  %v112_v30 = vmul.f32 %v2382_v46, %v2332_v58  ;;  %v2389_v11 = vld [vmem:[#allocation61_spill] sm:$0xff]  ;;  %v2390_v56 = vld [vmem:[#allocation11_spill] sm:$0xff]  ;;  %v2394_v0 = vld [vmem:[#allocation30_spill] sm:$0xff] }
  0x88   :  { %v206_v6 = vadd.f32 %v205_v44, %v130_v23  ;;  %v402_v33 = vmul.f32 %v2387_v63, %v2330_v50  ;;  %v188_v54 = vmul.f32 %v2383_v39, %v2333_v42  ;;  %v264_v16 = vmul.f32 %v2384_v31, %v2334_v1  ;;  %v2393_v44 = vld [vmem:[#allocation18_spill] sm:$0xff] }
  0x89   :  { %934 = vst.msk [vmem:[%s2131_s3 + $0x48] sm:$0xff] %vm802_vm0, %v789_v13  ;;  %v726_v36 = vadd.f32 %v725_v52, %v643_v49  ;;  %v558_v34 = vadd.f32 %v557_v24, %v471_v7  ;;  %v792_v58 = vmul.f32 %v2372_v51, %v1786_v3  ;;  %v489_v40 = vmul.f32 %v2389_v11, %v2388_v35  ;;  %v2395_v24 = vld [vmem:[#allocation31_spill] sm:$0xff]  ;;  %v2398_v49 = vld [vmem:[#allocation64_spill] sm:$0xff] }
  0x8a   :  { %v316_v50 = vadd.f32 %v315_v4, %v206_v6  ;;  %v576_v42 = vmul.f32 %v2391_v62, %v2390_v56  ;;  %v189_v15 = vadd.f32 %v188_v54, %v112_v30  ;;  %v385_v1 = vmul.f32 %v2386_v10, %v2392_v47  ;;  %v2396_v4 = vld [vmem:[#allocation32_spill] sm:$0xff]  ;;  %v2399_v30 = vld [vmem:[#allocation13_spill] sm:$0xff] }
  0x8b   :  { %v791_v45 = vadd.f32 %v790_v12, %v726_v36  ;;  %v645_v18 = vadd.f32 %v644_v61, %v558_v34  ;;  %v472_v52 = vmul.f32 %v2387_v63, %v2393_v44  ;;  %v114_v53 = vmul.f32 %v2382_v46, %v2394_v0  ;;  %v2397_v61 = vld [vmem:[#allocation12_spill] sm:$0xff]  ;;  %v2400_v6 = vld [vmem:[#allocation65_spill] sm:$0xff] }
  0x8c   :  { %v403_v51 = vadd.f32 %v402_v33, %v316_v50  ;;  %v265_v22 = vadd.f32 %v264_v16, %v189_v15  ;;  %v190_v23 = vmul.f32 %v2383_v39, %v2395_v24  ;;  %v266_v13 = vmul.f32 %v2384_v31, %v2396_v4 }
  0x8d   :  { %935 = vst.msk [vmem:[%s2131_s3 + $0x50] sm:$0xff] %vm802_vm0, %v791_v45  ;;  %v728_v12 = vadd.f32 %v727_v32, %v645_v18  ;;  %v681_v7 = vmul.f32 %v2398_v49, %v2397_v61  ;;  %v746_v54 = vmul.f32 %v2400_v6, %v2399_v30  ;;  %v559_v33 = vmul.f32 %v2389_v11, %v2373_v55 }
  0x8e   :  { %v490_v16 = vadd.f32 %v489_v40, %v403_v51  ;;  %v386_v36 = vadd.f32 %v385_v1, %v265_v22  ;;  %v191_v34 = vadd.f32 %v190_v23, %v114_v53  ;;  %v387_v35 = vmul.f32 %v2386_v10, %v2375_v2  ;;  %v2401_v2 = vld [vmem:[#allocation23_spill] sm:$0xff] }
  0x8f   :  { %v793_v50 = vadd.f32 %v792_v58, %v728_v12  ;;  %v646_v56 = vmul.f32 %v2391_v62, %v2374_v59  ;;  %v474_v32 = vmul.f32 %v2387_v63, %v2376_v57  ;;  %v116_v15 = vmul.f32 %v2382_v46, %v2377_v8  ;;  %v2402_v58 = vld [vmem:[#allocation50_spill] sm:$0xff] }
  0x90   :  { %v577_v47 = vadd.f32 %v576_v42, %v490_v16  ;;  %v473_v45 = vadd.f32 %v472_v52, %v386_v36  ;;  %v267_v18 = vadd.f32 %v266_v13, %v191_v34  ;;  %v192_v55 = vmul.f32 %v2383_v39, %v2378_v17  ;;  %v2403_v52 = vld [vmem:[#allocation25_spill] sm:$0xff] }
  0x91   :  { %936 = vst.msk [vmem:[%s2131_s3 + $0x58] sm:$0xff] %vm802_vm0, %v793_v50  ;;  %v729_v59 = vmul.f32 %v2398_v49, %v2401_v2  ;;  %v561_v57 = vmul.f32 %v2389_v11, %v2355_v25  ;;  %v268_v8 = vmul.f32 %v2384_v31, %v2402_v58  ;;  %v389_v40 = vmul.f32 %v2386_v10, %v2354_v19 }
  0x92   :  { %v682_v42 = vadd.f32 %v681_v7, %v577_v47  ;;  %v560_v1 = vadd.f32 %v559_v33, %v473_v45  ;;  %v388_v17 = vadd.f32 %v387_v35, %v267_v18  ;;  %v193_v44 = vadd.f32 %v192_v55, %v116_v15 }
  0x93   :  { %v794_v0 = vmul.f32 %v2400_v6, %v2403_v52  ;;  %v648_v53 = vmul.f32 %v2391_v62, %v2356_v9  ;;  %v476_v51 = vmul.f32 %v2387_v63, %v2357_v29  ;;  %v118_v25 = vmul.f32 %v2382_v46, %v1700_v26  ;;  %v2404_v46 = vld [vmem:[#allocation58_spill] sm:$0xff] }
  0x94   :  { %v747_v22 = vadd.f32 %v746_v54, %v682_v42  ;;  %v647_v24 = vadd.f32 %v646_v56, %v560_v1  ;;  %v475_v23 = vadd.f32 %v474_v32, %v388_v17  ;;  %v269_v19 = vadd.f32 %v268_v8, %v193_v44 }
  0x95   :  { %v731_v4 = vmul.f32 %v2398_v49, %v2358_v21  ;;  %v194_v13 = vmul.f32 %v2383_v39, %v1714_v20  ;;  %v270_v12 = vmul.f32 %v2384_v31, %v2380_v14  ;;  %v563_v61 = vmul.f32 %v2389_v11, %v2404_v46 }
  0x96   :  { %937 = vst.msk [vmem:[%s2130_s2 + $0x18] sm:$0xff] %vm802_vm0, %v747_v22  ;;  %v730_v29 = vadd.f32 %v729_v59, %v647_v24  ;;  %v562_v26 = vadd.f32 %v561_v57, %v475_v23  ;;  %v390_v9 = vadd.f32 %v389_v40, %v269_v19  ;;  %v796_v21 = vmul.f32 %v2400_v6, %v2381_v38 }
  0x97   :  { %v195_v7 = vadd.f32 %v194_v13, %v118_v25  ;;  %v391_v20 = vmul.f32 %v2386_v10, %v1747_v27  ;;  %v800_v14 = vmul.f32 %v2400_v6, %v1786_v3  ;;  %v650_v54 = vmul.f32 %v2391_v62, %v1664_v41 }
  0x98   :  { %v795_v39 = vadd.f32 %v794_v0, %v730_v29  ;;  %v649_v31 = vadd.f32 %v648_v53, %v562_v26  ;;  %v477_v30 = vadd.f32 %v476_v51, %v390_v9  ;;  %v478_v16 = vmul.f32 %v2387_v63, %v1764_v37 }
  0x99   :  { %v271_v33 = vadd.f32 %v270_v12, %v195_v7  ;;  %v733_v3 = vmul.f32 %v2398_v49, %v1654_v60  ;;  %v565_v36 = vmul.f32 %v2389_v11, %v2385_v48  ;;  %v798_v35 = vmul.f32 %v2400_v6, %v1656_v28 }
  0x9a   :  { %938 = vst.msk [vmem:[%s2131_s3 + $0x60] sm:$0xff] %vm802_vm0, %v795_v39  ;;  %v732_v38 = vadd.f32 %v731_v4, %v649_v31  ;;  %v564_v27 = vadd.f32 %v563_v61, %v477_v30  ;;  %v652_v63 = vmul.f32 %v2391_v62, %v1792_v43  ;;  %v735_v56 = vmul.f32 %v2398_v49, %v1782_v5 }
  0x9b   :  { %v392_v10 = vadd.f32 %v391_v20, %v271_v33 }
  0x9c   :  { %v797_v34 = vadd.f32 %v796_v21, %v732_v38  ;;  %v651_v41 = vadd.f32 %v650_v54, %v564_v27 }
  0x9d   :  { %v479_v37 = vadd.f32 %v478_v16, %v392_v10 }
  0x9e   :  { %939 = vst.msk [vmem:[%s2131_s3 + $0x68] sm:$0xff] %vm802_vm0, %v797_v34  ;;  %v734_v50 = vadd.f32 %v733_v3, %v651_v41 }
  0x9f   :  { %v566_v60 = vadd.f32 %v565_v36, %v479_v37 }
  0xa0   :  { %v799_v48 = vadd.f32 %v798_v35, %v734_v50 }
  0xa1   :  { %v653_v11 = vadd.f32 %v652_v63, %v566_v60 }
  0xa2   :  { %940 = vst.msk [vmem:[%s2131_s3 + $0x70] sm:$0xff] %vm802_vm0, %v799_v48 }
  0xa3   :  { %v736_v28 = vadd.f32 %v735_v56, %v653_v11 }
  0xa5   :  { %v801_v6 = vadd.f32 %v800_v14, %v736_v28 }
  0xa7   :  { %941 = vst.msk [vmem:[%s2131_s3 + $0x78] sm:$0xff] %vm802_vm0, %v801_v6 }

</bundles_post_ra>
